<compile_context>
chip_gen: v7x
topology: tpu7x:2x2x1
jax: 0.10.0
libtpu: 0.0.40
codegen_flags: <defaults>
</compile_context>

<pallas_src>
from functools import partial

import jax
import jax.numpy as jnp
import numpy as np
from jax.experimental import pallas as pl
from jax.experimental.pallas import tpu as pltpu


def _round_up(x, m):
    return ((x + m - 1) // m) * m


def _noisy_gru_seq_kernel(gi_ref, noise_ref, h0_ref, whh_ref, bhhn_ref,
                          hpre_ref, h_scratch, *, tt_block):
    """Processes TT timesteps per grid step.  grid = (batch_shard, time_block)."""
    Hp = h_scratch.shape[-1]
    mxu_dtype = whh_ref.dtype

    # First time-block of this batch shard: load the initial hidden state.
    @pl.when(pl.program_id(1) == 0)
    def _():
        h_scratch[...] = h0_ref[...].astype(jnp.float32)

    def step(tt, carry):
        h = h_scratch[...]                                     # (Bb, Hp) f32
        gi = gi_ref[tt].astype(jnp.float32)                    # (Bb, 3Hp), biases folded
        gh = jnp.dot(h.astype(mxu_dtype), whh_ref[...],
                     preferred_element_type=jnp.float32)       # (Bb, 3Hp) f32 acc

        # Lane-tile-aligned gate slices (Hp multiple of 128 -> zero-cost views).
        i_r, i_z, i_n = gi[:, 0:Hp], gi[:, Hp:2 * Hp], gi[:, 2 * Hp:3 * Hp]
        h_r, h_z = gh[:, 0:Hp], gh[:, Hp:2 * Hp]
        h_n = gh[:, 2 * Hp:3 * Hp] + bhhn_ref[...]             # n-gate hidden bias (scaled by r)

        r = jax.nn.sigmoid(i_r + h_r)
        z = jax.nn.sigmoid(i_z + h_z)
        n = jnp.tanh(i_n + r * h_n)
        h_new = n + z * (h - n)                                # == (1-z)*n + z*h

        hpre_ref[tt] = h_new.astype(hpre_ref.dtype)            # pre-noise hidden out
        h_scratch[...] = h_new + noise_ref[tt]                 # noisy carry -> next step
        return carry

    jax.lax.fori_loop(0, tt_block, step, 0, unroll=True)


def noisy_gru_sequence(xs, h0, weight_ih, weight_hh, bias_ih, bias_hh,
                       w_ro, b_ro, noise, *, batch_block=None, time_block=16,
                       mxu_dtype=jnp.bfloat16):
    """Fused T-step NoisyGRU.

    xs: (T, B, I), h0: (B, H), weight_ih: (3H, I), weight_hh: (3H, H),
    bias_ih/bias_hh: (3H,), w_ro: (O, H), b_ro: (O,), noise: (T, B, H).
    Returns (outputs (T, B, O), hiddens (T, B, H)) -- hiddens are post-noise,
    exactly what T consecutive NoisyGRU.forward calls would return.
    """
    T, B, I = xs.shape
    H = h0.shape[1]
    O = w_ro.shape[0]
    f32 = jnp.float32

    Hp = _round_up(H, 128)                      # per-gate lane padding
    Bb = B if batch_block is None else batch_block
    assert B % Bb == 0 and (Bb == B or Bb % 8 == 0), \
        "batch block must divide B and be a multiple of 8"
    nb = B // Bb
    TT = max(1, min(int(time_block), T))        # timesteps fused per grid step
    nT = pl.cdiv(T, TT)
    Tp = nT * TT

    # ---- weight / bias prep (pad gate dim H -> Hp, pre-transpose) ------------
    wih = weight_ih.astype(f32).reshape(3, H, I)
    wih_p = jnp.zeros((3, Hp, I), f32).at[:, :H, :].set(wih)
    wih_t = jnp.transpose(wih_p, (2, 0, 1)).reshape(I, 3 * Hp)           # (I, 3Hp)

    whh = weight_hh.astype(f32).reshape(3, H, H)
    whh_p = jnp.zeros((3, Hp, H), f32).at[:, :H, :].set(whh)
    whh_t = jnp.transpose(whh_p, (2, 0, 1)).reshape(H, 3 * Hp)
    whh_t = jnp.zeros((Hp, 3 * Hp), f32).at[:H, :].set(whh_t)            # (Hp, 3Hp)
    whh_t = whh_t.astype(mxu_dtype)                                      # MXU-native

    bih = bias_ih.astype(f32).reshape(3, H)
    bhh = bias_hh.astype(f32).reshape(3, H)
    # r/z biases are pre-summed into the hoisted input projection; the n-gate
    # hidden bias must stay inside the step (it is scaled by r).
    b_fold = jnp.stack([bih[0] + bhh[0], bih[1] + bhh[1], bih[2]], axis=0)
    b_fold = jnp.zeros((3, Hp), f32).at[:, :H].set(b_fold).reshape(1, 3 * Hp)
    bhh_n = jnp.zeros((1, Hp), f32).at[0, :H].set(bhh[2])

    # ---- hoisted input projection: one big MXU matmul outside the recurrence -
    gi = (xs.astype(f32).reshape(T * B, I) @ wih_t + b_fold).reshape(T, B, 3 * Hp)
    gi = gi.astype(mxu_dtype)                   # halves the dominant HBM stream

    # ---- zero-pad the recurrent tensors along the hidden lane dim ------------
    h0_p = jnp.zeros((B, Hp), f32).at[:, :H].set(h0.astype(f32))
    noise_p = jnp.zeros((T, B, Hp), f32).at[:, :, :H].set(noise.astype(f32))

    # ---- pad the time axis to a multiple of the time block --------------------
    if Tp != T:
        gi = jnp.pad(gi, ((0, Tp - T), (0, 0), (0, 0)))
        noise_p = jnp.pad(noise_p, ((0, Tp - T), (0, 0), (0, 0)))

    # ---- VMEM budget (matters on v7x: 64 MiB physical, 32 MiB default scoped) -
    mxu_bytes = jnp.dtype(mxu_dtype).itemsize
    vmem_bytes = (
        2 * TT * Bb * 3 * Hp * mxu_bytes        # gi stream (double-buffered)
        + 2 * TT * Bb * Hp * 4                  # noise stream
        + 2 * TT * Bb * Hp * 4                  # h_pre output stream
        + 2 * Bb * Hp * 4                       # h0
        + 2 * Hp * 3 * Hp * mxu_bytes           # resident W_hh
        + 2 * Hp * 4                            # bhh_n
        + Bb * Hp * 4)                          # carried hidden scratch
    compiler_extra = {}
    if vmem_bytes > 30 * 1024 * 1024:
        # TODO(synk): for very large H also single-buffer W_hh
        #             (pipeline_mode=pl.Buffered(1)) or K-tile the h@Whh matmul.
        compiler_extra["vmem_limit_bytes"] = min(int(vmem_bytes * 1.25),
                                                 64 * 1024 * 1024)

    hpre_p = pl.pallas_call(
        partial(_noisy_gru_seq_kernel, tt_block=TT),
        out_shape=jax.ShapeDtypeStruct((Tp, B, Hp), jnp.float32),
        grid_spec=pltpu.PrefetchScalarGridSpec(
            num_scalar_prefetch=0,
            grid=(nb, nT),
            in_specs=[
                pl.BlockSpec((TT, Bb, 3 * Hp), lambda b, t: (t, b, 0)),  # gi (streamed)
                pl.BlockSpec((TT, Bb, Hp),     lambda b, t: (t, b, 0)),  # noise (streamed)
                pl.BlockSpec((Bb, Hp),         lambda b, t: (b, 0)),     # h0
                pl.BlockSpec((Hp, 3 * Hp),     lambda b, t: (0, 0)),     # whh (resident)
                pl.BlockSpec((1, Hp),          lambda b, t: (0, 0)),     # bhh_n (resident)
            ],
            out_specs=pl.BlockSpec((TT, Bb, Hp), lambda b, t: (t, b, 0)),  # pre-noise h
            scratch_shapes=[pltpu.VMEM((Bb, Hp), jnp.float32)],           # carried h
        ),
        compiler_params=pltpu.CompilerParams(
            dimension_semantics=("parallel", "arbitrary"), **compiler_extra),
    )(gi, noise_p, h0_p, whh_t, bhh_n)

    # ---- hoisted readout + noisy hidden (glue; one dense MXU matmul) ---------
    h_pre = hpre_p[:T, :, :H]                                   # (T, B, H) f32
    outs = (h_pre.reshape(T * B, H) @ jnp.transpose(w_ro).astype(f32)
            + b_ro.astype(f32)).reshape(T, B, O)
    hiddens = h_pre + noise.astype(f32)         # identical f32 add to the kernel carry
    return outs.astype(xs.dtype), hiddens.astype(xs.dtype)


def noisy_gru_forward(x, h, weight_ih, weight_hh, bias_ih, bias_hh,
                      w_ro, b_ro, noise, **kwargs):
    """Exact NoisyGRU.forward (single step): returns (output, noisy hidden)."""
    outs, hids = noisy_gru_sequence(x[None], h, weight_ih, weight_hh, bias_ih,
                                    bias_hh, w_ro, b_ro, noise[None], **kwargs)
    return outs[0], hids[0]


def noisy_gru_reference(xs, h0, weight_ih, weight_hh, bias_ih, bias_hh,
                        w_ro, b_ro, noise):
    """Pure-JAX f32 reference (mirrors torch.nn.GRUCell math, looped over T)."""
    H = h0.shape[1]

    def step(h, inp):
        x_t, noise_t = inp
        gi = x_t @ weight_ih.T + bias_ih
        gh = h @ weight_hh.T + bias_hh
        i_r, i_z, i_n = gi[:, :H], gi[:, H:2 * H], gi[:, 2 * H:]
        h_r, h_z, h_n = gh[:, :H], gh[:, H:2 * H], gh[:, 2 * H:]
        r = jax.nn.sigmoid(i_r + h_r)
        z = jax.nn.sigmoid(i_z + h_z)
        n = jnp.tanh(i_n + r * h_n)
        h_new = (1.0 - z) * n + z * h
        out = h_new @ w_ro.T + b_ro
        h_next = h_new + noise_t
        return h_next, (out, h_next)

    _, (outs, hiddens) = jax.lax.scan(step, h0, (xs, noise))
    return outs, hiddens


if __name__ == "__main__":
    # Small shapes consistent with the module's forward, with a fused sequence.
    T = 8            # timesteps fused into one kernel call
    B = 16           # batch
    I = 16           # input_size
    H = 32           # latent_size (hidden)
    O = 8            # output_size
    noise_level = 0.05
    latent_ic_var = 0.05

    key = jax.random.PRNGKey(0)
    (k_x, k_wih, k_whh, k_bih, k_bhh, k_wro, k_bro,
     k_icnoise, k_noise) = jax.random.split(key, 9)

    dtype = jnp.float32
    bound = 1.0 / np.sqrt(H)   # PyTorch GRUCell default init range

    xs = jax.random.normal(k_x, (T, B, I), dtype)

    # Deterministic parameter init (shapes match torch GRUCell / Linear).
    weight_ih = jax.random.uniform(k_wih, (3 * H, I), dtype, -bound, bound)
    weight_hh = jax.random.uniform(k_whh, (3 * H, H), dtype, -bound, bound)
    bias_ih = jax.random.uniform(k_bih, (3 * H,), dtype, -bound, bound)
    bias_hh = jax.random.uniform(k_bhh, (3 * H,), dtype, -bound, bound)
    w_ro = jax.random.uniform(k_wro, (O, H), dtype, -bound, bound)
    b_ro = jax.random.uniform(k_bro, (O,), dtype, -bound, bound)

    # init_hidden: latent_ics (zeros) broadcast + gaussian IC noise.
    latent_ics = jnp.zeros((H,), dtype)
    h0 = latent_ics[None, :] + jax.random.normal(k_icnoise, (B, H), dtype) * latent_ic_var

    # forward-pass additive hidden noise, one draw per timestep.
    noise = jax.random.normal(k_noise, (T, B, H), dtype) * noise_level

    outs_ref, hiddens_ref = noisy_gru_reference(
        xs, h0, weight_ih, weight_hh, bias_ih, bias_hh, w_ro, b_ro, noise)

    run_seq = jax.jit(noisy_gru_sequence,
                      static_argnames=("batch_block", "time_block", "mxu_dtype"))

    # Default fast path: bf16 MXU operands / bf16-streamed gi, f32 accumulation
    # and gate math.  Tolerance reflects bf16 quantization over the recurrence;
    # exact semantics are proven by the f32 run below.
    outs_bf, hid_bf = run_seq(xs, h0, weight_ih, weight_hh, bias_ih, bias_hh,
                              w_ro, b_ro, noise, batch_block=None,
                              time_block=8, mxu_dtype=jnp.bfloat16)
    jax.block_until_ready((outs_bf, hid_bf))
    np.testing.assert_allclose(np.asarray(outs_bf), np.asarray(outs_ref),
                               rtol=1e-1, atol=1e-1)
    np.testing.assert_allclose(np.asarray(hid_bf), np.asarray(hiddens_ref),
                               rtol=1e-1, atol=1e-1)

    # Exact-precision path (f32 MXU operands) matches the module numerics.
    outs_f32, hid_f32 = run_seq(xs, h0, weight_ih, weight_hh, bias_ih, bias_hh,
                                w_ro, b_ro, noise, batch_block=None,
                                time_block=8, mxu_dtype=jnp.float32)
    jax.block_until_ready((outs_f32, hid_f32))
    np.testing.assert_allclose(np.asarray(outs_f32), np.asarray(outs_ref),
                               rtol=1e-4, atol=1e-5)
    np.testing.assert_allclose(np.asarray(hid_f32), np.asarray(hiddens_ref),
                               rtol=1e-4, atol=1e-5)

    # Single-step path (exact module forward signature) goes through the same
    # kernel with T = 1.
    out1, hid1 = noisy_gru_forward(xs[0], h0, weight_ih, weight_hh, bias_ih,
                                   bias_hh, w_ro, b_ro, noise[0],
                                   mxu_dtype=jnp.float32)
    jax.block_until_ready((out1, hid1))
    np.testing.assert_allclose(np.asarray(out1), np.asarray(outs_ref[0]),
                               rtol=1e-4, atol=1e-5)
    np.testing.assert_allclose(np.asarray(hid1), np.asarray(hiddens_ref[0]),
                               rtol=1e-4, atol=1e-5)

    print("KERNEL_OK")
</pallas_src>

<mosaic_0001>
module attributes {stable_mosaic.version = 11 : i64} {
  func.func @_noisy_gru_seq_kernel(%arg0: i32, %arg1: i32, %arg2: memref<8x16x384xbf16, #tpu.memory_space<vmem>>, %arg3: memref<8x16x128xf32, #tpu.memory_space<vmem>>, %arg4: memref<16x128xf32, #tpu.memory_space<vmem>>, %arg5: memref<128x384xbf16, #tpu.memory_space<vmem>>, %arg6: memref<1x128xf32, #tpu.memory_space<vmem>>, %arg7: memref<8x16x128xf32, #tpu.memory_space<vmem>>, %arg8: memref<16x128xf32, #tpu.memory_space<vmem>>) attributes {dimension_semantics = [#tpu.dimension_semantics<parallel>, #tpu.dimension_semantics<arbitrary>], iteration_bounds = array<i64: 1, 1>, scalar_prefetch = 0 : i64, scratch_operands = 1 : i64, tpu.core_type = #tpu.core_type<tc>, window_params = [{transform_indices = @transform_0, window_bounds = array<i64: 8, 16, 384>}, {transform_indices = @transform_1, window_bounds = array<i64: 8, 16, 128>}, {transform_indices = @transform_2, window_bounds = array<i64: 16, 128>}, {pipeline_mode = #tpu.pipeline_mode<synchronous>, transform_indices = @transform_3, window_bounds = array<i64: 128, 384>}, {pipeline_mode = #tpu.pipeline_mode<synchronous>, transform_indices = @transform_4, window_bounds = array<i64: 1, 128>}, {transform_indices = @transform_5, window_bounds = array<i64: 8, 16, 128>}]} {
    %c0_i32 = arith.constant 0 : i32
    %0 = arith.cmpi eq, %arg1, %c0_i32 : i32
    %1 = arith.extui %0 : i1 to i32
    %c0_i32_0 = arith.constant 0 : i32
    %2 = arith.cmpi ne, %1, %c0_i32_0 : i32
    scf.if %2 {
      %c0_136 = arith.constant 0 : index
      %c0_137 = arith.constant 0 : index
      %355 = vector.load %arg4[%c0_136, %c0_137] : memref<16x128xf32, #tpu.memory_space<vmem>>, vector<16x128xf32>
      %c0_138 = arith.constant 0 : index
      %c0_139 = arith.constant 0 : index
      %356 = vector.load %arg8[%c0_138, %c0_139] : memref<16x128xf32, #tpu.memory_space<vmem>>, vector<16x128xf32>
      tpu.vector_store %arg8[%c0_138, %c0_139], %355 {strides = array<i32>} : memref<16x128xf32, #tpu.memory_space<vmem>>, vector<16x128xf32>,
    } else {
    }
    %c0_i32_1 = arith.constant 0 : i32
    %c0 = arith.constant 0 : index
    %c0_2 = arith.constant 0 : index
    %3 = vector.load %arg8[%c0, %c0_2] : memref<16x128xf32, #tpu.memory_space<vmem>>, vector<16x128xf32>
    %4 = arith.index_cast %c0_i32_1 : i32 to index
    %c0_3 = arith.constant 0 : index
    %c0_4 = arith.constant 0 : index
    %5 = vector.load %arg2[%4, %c0_3, %c0_4] : memref<8x16x384xbf16, #tpu.memory_space<vmem>>, vector<1x16x384xbf16>
    %6 = vector.shape_cast %5 : vector<1x16x384xbf16> to vector<16x384xbf16>
    %7 = arith.extf %6 : vector<16x384xbf16> to vector<16x384xf32>
    %8 = arith.truncf %3 : vector<16x128xf32> to vector<16x128xbf16>
    %c0_5 = arith.constant 0 : index
    %c0_6 = arith.constant 0 : index
    %9 = vector.load %arg5[%c0_5, %c0_6] : memref<128x384xbf16, #tpu.memory_space<vmem>>, vector<128x384xbf16>
    %cst = arith.constant dense<0.000000e+00> : vector<16x384xf32>
    %10 = tpu.matmul %8, %9, %cst {dimension_numbers = #tpu.dot_dimension_numbers<[1], [0], [0], [1], [0, 0, 1, 1], [], []>} : vector<16x128xbf16>, vector<128x384xbf16>, vector<16x384xf32> -> vector<16x384xf32>
    %11 = vector.extract_strided_slice %7 {offsets = [0, 0], sizes = [16, 128], strides = [1, 1]} : vector<16x384xf32> to vector<16x128xf32>
    %12 = vector.extract_strided_slice %7 {offsets = [0, 128], sizes = [16, 128], strides = [1, 1]} : vector<16x384xf32> to vector<16x128xf32>
    %13 = vector.extract_strided_slice %7 {offsets = [0, 256], sizes = [16, 128], strides = [1, 1]} : vector<16x384xf32> to vector<16x128xf32>
    %14 = vector.extract_strided_slice %10 {offsets = [0, 0], sizes = [16, 128], strides = [1, 1]} : vector<16x384xf32> to vector<16x128xf32>
    %15 = vector.extract_strided_slice %10 {offsets = [0, 128], sizes = [16, 128], strides = [1, 1]} : vector<16x384xf32> to vector<16x128xf32>
    %16 = vector.extract_strided_slice %10 {offsets = [0, 256], sizes = [16, 128], strides = [1, 1]} : vector<16x384xf32> to vector<16x128xf32>
    %c0_7 = arith.constant 0 : index
    %c0_8 = arith.constant 0 : index
    %17 = vector.load %arg6[%c0_7, %c0_8] : memref<1x128xf32, #tpu.memory_space<vmem>>, vector<1x128xf32>
    %18 = vector.broadcast %17 : vector<1x128xf32> to vector<16x128xf32>
    %19 = arith.addf %16, %18 : vector<16x128xf32>
    %20 = arith.addf %11, %14 : vector<16x128xf32>
    %21 = arith.negf %20 : vector<16x128xf32>
    %22 = math.exp %21 : vector<16x128xf32>
    %cst_9 = arith.constant 1.000000e+00 : f32
    %23 = vector.broadcast %cst_9 : f32 to vector<16x128xf32>
    %24 = arith.addf %23, %22 : vector<16x128xf32>
    %25 = arith.divf %23, %24 : vector<16x128xf32>
    %26 = arith.addf %12, %15 : vector<16x128xf32>
    %27 = arith.negf %26 : vector<16x128xf32>
    %28 = math.exp %27 : vector<16x128xf32>
    %cst_10 = arith.constant 1.000000e+00 : f32
    %29 = vector.broadcast %cst_10 : f32 to vector<16x128xf32>
    %30 = arith.addf %29, %28 : vector<16x128xf32>
    %31 = arith.divf %29, %30 : vector<16x128xf32>
    %32 = arith.mulf %25, %19 : vector<16x128xf32>
    %33 = arith.addf %13, %32 : vector<16x128xf32>
    %34 = math.tanh %33 : vector<16x128xf32>
    %35 = arith.subf %3, %34 : vector<16x128xf32>
    %36 = arith.mulf %31, %35 : vector<16x128xf32>
    %37 = arith.addf %34, %36 : vector<16x128xf32>
    %38 = arith.index_cast %c0_i32_1 : i32 to index
    %c0_11 = arith.constant 0 : index
    %c0_12 = arith.constant 0 : index
    %39 = vector.load %arg7[%38, %c0_11, %c0_12] : memref<8x16x128xf32, #tpu.memory_space<vmem>>, vector<1x16x128xf32>
    %40 = vector.shape_cast %39 : vector<1x16x128xf32> to vector<16x128xf32>
    %41 = vector.shape_cast %37 : vector<16x128xf32> to vector<1x16x128xf32>
    tpu.vector_store %arg7[%38, %c0_11, %c0_12], %41 {strides = array<i32>} : memref<8x16x128xf32, #tpu.memory_space<vmem>>, vector<1x16x128xf32>,
    %42 = arith.index_cast %c0_i32_1 : i32 to index
    %c0_13 = arith.constant 0 : index
    %c0_14 = arith.constant 0 : index
    %43 = vector.load %arg3[%42, %c0_13, %c0_14] : memref<8x16x128xf32, #tpu.memory_space<vmem>>, vector<1x16x128xf32>
    %44 = vector.shape_cast %43 : vector<1x16x128xf32> to vector<16x128xf32>
    %45 = arith.addf %37, %44 : vector<16x128xf32>
    %c0_15 = arith.constant 0 : index
    %c0_16 = arith.constant 0 : index
    %46 = vector.load %arg8[%c0_15, %c0_16] : memref<16x128xf32, #tpu.memory_space<vmem>>, vector<16x128xf32>
    tpu.vector_store %arg8[%c0_15, %c0_16], %45 {strides = array<i32>} : memref<16x128xf32, #tpu.memory_space<vmem>>, vector<16x128xf32>,
    %c1_i32 = arith.constant 1 : i32
    %c0_17 = arith.constant 0 : index
    %c0_18 = arith.constant 0 : index
    %47 = vector.load %arg8[%c0_17, %c0_18] : memref<16x128xf32, #tpu.memory_space<vmem>>, vector<16x128xf32>
    %48 = arith.index_cast %c1_i32 : i32 to index
    %c0_19 = arith.constant 0 : index
    %c0_20 = arith.constant 0 : index
    %49 = vector.load %arg2[%48, %c0_19, %c0_20] : memref<8x16x384xbf16, #tpu.memory_space<vmem>>, vector<1x16x384xbf16>
    %50 = vector.shape_cast %49 : vector<1x16x384xbf16> to vector<16x384xbf16>
    %51 = arith.extf %50 : vector<16x384xbf16> to vector<16x384xf32>
    %52 = arith.truncf %47 : vector<16x128xf32> to vector<16x128xbf16>
    %c0_21 = arith.constant 0 : index
    %c0_22 = arith.constant 0 : index
    %53 = vector.load %arg5[%c0_21, %c0_22] : memref<128x384xbf16, #tpu.memory_space<vmem>>, vector<128x384xbf16>
    %cst_23 = arith.constant dense<0.000000e+00> : vector<16x384xf32>
    %54 = tpu.matmul %52, %53, %cst_23 {dimension_numbers = #tpu.dot_dimension_numbers<[1], [0], [0], [1], [0, 0, 1, 1], [], []>} : vector<16x128xbf16>, vector<128x384xbf16>, vector<16x384xf32> -> vector<16x384xf32>
    %55 = vector.extract_strided_slice %51 {offsets = [0, 0], sizes = [16, 128], strides = [1, 1]} : vector<16x384xf32> to vector<16x128xf32>
    %56 = vector.extract_strided_slice %51 {offsets = [0, 128], sizes = [16, 128], strides = [1, 1]} : vector<16x384xf32> to vector<16x128xf32>
    %57 = vector.extract_strided_slice %51 {offsets = [0, 256], sizes = [16, 128], strides = [1, 1]} : vector<16x384xf32> to vector<16x128xf32>
    %58 = vector.extract_strided_slice %54 {offsets = [0, 0], sizes = [16, 128], strides = [1, 1]} : vector<16x384xf32> to vector<16x128xf32>
    %59 = vector.extract_strided_slice %54 {offsets = [0, 128], sizes = [16, 128], strides = [1, 1]} : vector<16x384xf32> to vector<16x128xf32>
    %60 = vector.extract_strided_slice %54 {offsets = [0, 256], sizes = [16, 128], strides = [1, 1]} : vector<16x384xf32> to vector<16x128xf32>
    %c0_24 = arith.constant 0 : index
    %c0_25 = arith.constant 0 : index
    %61 = vector.load %arg6[%c0_24, %c0_25] : memref<1x128xf32, #tpu.memory_space<vmem>>, vector<1x128xf32>
    %62 = vector.broadcast %61 : vector<1x128xf32> to vector<16x128xf32>
    %63 = arith.addf %60, %62 : vector<16x128xf32>
    %64 = arith.addf %55, %58 : vector<16x128xf32>
    %65 = arith.negf %64 : vector<16x128xf32>
    %66 = math.exp %65 : vector<16x128xf32>
    %cst_26 = arith.constant 1.000000e+00 : f32
    %67 = vector.broadcast %cst_26 : f32 to vector<16x128xf32>
    %68 = arith.addf %67, %66 : vector<16x128xf32>
    %69 = arith.divf %67, %68 : vector<16x128xf32>
    %70 = arith.addf %56, %59 : vector<16x128xf32>
    %71 = arith.negf %70 : vector<16x128xf32>
    %72 = math.exp %71 : vector<16x128xf32>
    %cst_27 = arith.constant 1.000000e+00 : f32
    %73 = vector.broadcast %cst_27 : f32 to vector<16x128xf32>
    %74 = arith.addf %73, %72 : vector<16x128xf32>
    %75 = arith.divf %73, %74 : vector<16x128xf32>
    %76 = arith.mulf %69, %63 : vector<16x128xf32>
    %77 = arith.addf %57, %76 : vector<16x128xf32>
    %78 = math.tanh %77 : vector<16x128xf32>
    %79 = arith.subf %47, %78 : vector<16x128xf32>
    %80 = arith.mulf %75, %79 : vector<16x128xf32>
    %81 = arith.addf %78, %80 : vector<16x128xf32>
    %82 = arith.index_cast %c1_i32 : i32 to index
    %c0_28 = arith.constant 0 : index
    %c0_29 = arith.constant 0 : index
    %83 = vector.load %arg7[%82, %c0_28, %c0_29] : memref<8x16x128xf32, #tpu.memory_space<vmem>>, vector<1x16x128xf32>
    %84 = vector.shape_cast %83 : vector<1x16x128xf32> to vector<16x128xf32>
    %85 = vector.shape_cast %81 : vector<16x128xf32> to vector<1x16x128xf32>
    tpu.vector_store %arg7[%82, %c0_28, %c0_29], %85 {strides = array<i32>} : memref<8x16x128xf32, #tpu.memory_space<vmem>>, vector<1x16x128xf32>,
    %86 = arith.index_cast %c1_i32 : i32 to index
    %c0_30 = arith.constant 0 : index
    %c0_31 = arith.constant 0 : index
    %87 = vector.load %arg3[%86, %c0_30, %c0_31] : memref<8x16x128xf32, #tpu.memory_space<vmem>>, vector<1x16x128xf32>
    %88 = vector.shape_cast %87 : vector<1x16x128xf32> to vector<16x128xf32>
    %89 = arith.addf %81, %88 : vector<16x128xf32>
    %c0_32 = arith.constant 0 : index
    %c0_33 = arith.constant 0 : index
    %90 = vector.load %arg8[%c0_32, %c0_33] : memref<16x128xf32, #tpu.memory_space<vmem>>, vector<16x128xf32>
    tpu.vector_store %arg8[%c0_32, %c0_33], %89 {strides = array<i32>} : memref<16x128xf32, #tpu.memory_space<vmem>>, vector<16x128xf32>,
    %c2_i32 = arith.constant 2 : i32
    %c0_34 = arith.constant 0 : index
    %c0_35 = arith.constant 0 : index
    %91 = vector.load %arg8[%c0_34, %c0_35] : memref<16x128xf32, #tpu.memory_space<vmem>>, vector<16x128xf32>
    %92 = arith.index_cast %c2_i32 : i32 to index
    %c0_36 = arith.constant 0 : index
    %c0_37 = arith.constant 0 : index
    %93 = vector.load %arg2[%92, %c0_36, %c0_37] : memref<8x16x384xbf16, #tpu.memory_space<vmem>>, vector<1x16x384xbf16>
    %94 = vector.shape_cast %93 : vector<1x16x384xbf16> to vector<16x384xbf16>
    %95 = arith.extf %94 : vector<16x384xbf16> to vector<16x384xf32>
    %96 = arith.truncf %91 : vector<16x128xf32> to vector<16x128xbf16>
    %c0_38 = arith.constant 0 : index
    %c0_39 = arith.constant 0 : index
    %97 = vector.load %arg5[%c0_38, %c0_39] : memref<128x384xbf16, #tpu.memory_space<vmem>>, vector<128x384xbf16>
    %cst_40 = arith.constant dense<0.000000e+00> : vector<16x384xf32>
    %98 = tpu.matmul %96, %97, %cst_40 {dimension_numbers = #tpu.dot_dimension_numbers<[1], [0], [0], [1], [0, 0, 1, 1], [], []>} : vector<16x128xbf16>, vector<128x384xbf16>, vector<16x384xf32> -> vector<16x384xf32>
    %99 = vector.extract_strided_slice %95 {offsets = [0, 0], sizes = [16, 128], strides = [1, 1]} : vector<16x384xf32> to vector<16x128xf32>
    %100 = vector.extract_strided_slice %95 {offsets = [0, 128], sizes = [16, 128], strides = [1, 1]} : vector<16x384xf32> to vector<16x128xf32>
    %101 = vector.extract_strided_slice %95 {offsets = [0, 256], sizes = [16, 128], strides = [1, 1]} : vector<16x384xf32> to vector<16x128xf32>
    %102 = vector.extract_strided_slice %98 {offsets = [0, 0], sizes = [16, 128], strides = [1, 1]} : vector<16x384xf32> to vector<16x128xf32>
    %103 = vector.extract_strided_slice %98 {offsets = [0, 128], sizes = [16, 128], strides = [1, 1]} : vector<16x384xf32> to vector<16x128xf32>
    %104 = vector.extract_strided_slice %98 {offsets = [0, 256], sizes = [16, 128], strides = [1, 1]} : vector<16x384xf32> to vector<16x128xf32>
    %c0_41 = arith.constant 0 : index
    %c0_42 = arith.constant 0 : index
    %105 = vector.load %arg6[%c0_41, %c0_42] : memref<1x128xf32, #tpu.memory_space<vmem>>, vector<1x128xf32>
    %106 = vector.broadcast %105 : vector<1x128xf32> to vector<16x128xf32>
    %107 = arith.addf %104, %106 : vector<16x128xf32>
    %108 = arith.addf %99, %102 : vector<16x128xf32>
    %109 = arith.negf %108 : vector<16x128xf32>
    %110 = math.exp %109 : vector<16x128xf32>
    %cst_43 = arith.constant 1.000000e+00 : f32
    %111 = vector.broadcast %cst_43 : f32 to vector<16x128xf32>
    %112 = arith.addf %111, %110 : vector<16x128xf32>
    %113 = arith.divf %111, %112 : vector<16x128xf32>
    %114 = arith.addf %100, %103 : vector<16x128xf32>
    %115 = arith.negf %114 : vector<16x128xf32>
    %116 = math.exp %115 : vector<16x128xf32>
    %cst_44 = arith.constant 1.000000e+00 : f32
    %117 = vector.broadcast %cst_44 : f32 to vector<16x128xf32>
    %118 = arith.addf %117, %116 : vector<16x128xf32>
    %119 = arith.divf %117, %118 : vector<16x128xf32>
    %120 = arith.mulf %113, %107 : vector<16x128xf32>
    %121 = arith.addf %101, %120 : vector<16x128xf32>
    %122 = math.tanh %121 : vector<16x128xf32>
    %123 = arith.subf %91, %122 : vector<16x128xf32>
    %124 = arith.mulf %119, %123 : vector<16x128xf32>
    %125 = arith.addf %122, %124 : vector<16x128xf32>
    %126 = arith.index_cast %c2_i32 : i32 to index
    %c0_45 = arith.constant 0 : index
    %c0_46 = arith.constant 0 : index
    %127 = vector.load %arg7[%126, %c0_45, %c0_46] : memref<8x16x128xf32, #tpu.memory_space<vmem>>, vector<1x16x128xf32>
    %128 = vector.shape_cast %127 : vector<1x16x128xf32> to vector<16x128xf32>
    %129 = vector.shape_cast %125 : vector<16x128xf32> to vector<1x16x128xf32>
    tpu.vector_store %arg7[%126, %c0_45, %c0_46], %129 {strides = array<i32>} : memref<8x16x128xf32, #tpu.memory_space<vmem>>, vector<1x16x128xf32>,
    %130 = arith.index_cast %c2_i32 : i32 to index
    %c0_47 = arith.constant 0 : index
    %c0_48 = arith.constant 0 : index
    %131 = vector.load %arg3[%130, %c0_47, %c0_48] : memref<8x16x128xf32, #tpu.memory_space<vmem>>, vector<1x16x128xf32>
    %132 = vector.shape_cast %131 : vector<1x16x128xf32> to vector<16x128xf32>
    %133 = arith.addf %125, %132 : vector<16x128xf32>
    %c0_49 = arith.constant 0 : index
    %c0_50 = arith.constant 0 : index
    %134 = vector.load %arg8[%c0_49, %c0_50] : memref<16x128xf32, #tpu.memory_space<vmem>>, vector<16x128xf32>
    tpu.vector_store %arg8[%c0_49, %c0_50], %133 {strides = array<i32>} : memref<16x128xf32, #tpu.memory_space<vmem>>, vector<16x128xf32>,
    %c3_i32 = arith.constant 3 : i32
    %c0_51 = arith.constant 0 : index
    %c0_52 = arith.constant 0 : index
    %135 = vector.load %arg8[%c0_51, %c0_52] : memref<16x128xf32, #tpu.memory_space<vmem>>, vector<16x128xf32>
    %136 = arith.index_cast %c3_i32 : i32 to index
    %c0_53 = arith.constant 0 : index
    %c0_54 = arith.constant 0 : index
    %137 = vector.load %arg2[%136, %c0_53, %c0_54] : memref<8x16x384xbf16, #tpu.memory_space<vmem>>, vector<1x16x384xbf16>
    %138 = vector.shape_cast %137 : vector<1x16x384xbf16> to vector<16x384xbf16>
    %139 = arith.extf %138 : vector<16x384xbf16> to vector<16x384xf32>
    %140 = arith.truncf %135 : vector<16x128xf32> to vector<16x128xbf16>
    %c0_55 = arith.constant 0 : index
    %c0_56 = arith.constant 0 : index
    %141 = vector.load %arg5[%c0_55, %c0_56] : memref<128x384xbf16, #tpu.memory_space<vmem>>, vector<128x384xbf16>
    %cst_57 = arith.constant dense<0.000000e+00> : vector<16x384xf32>
    %142 = tpu.matmul %140, %141, %cst_57 {dimension_numbers = #tpu.dot_dimension_numbers<[1], [0], [0], [1], [0, 0, 1, 1], [], []>} : vector<16x128xbf16>, vector<128x384xbf16>, vector<16x384xf32> -> vector<16x384xf32>
    %143 = vector.extract_strided_slice %139 {offsets = [0, 0], sizes = [16, 128], strides = [1, 1]} : vector<16x384xf32> to vector<16x128xf32>
    %144 = vector.extract_strided_slice %139 {offsets = [0, 128], sizes = [16, 128], strides = [1, 1]} : vector<16x384xf32> to vector<16x128xf32>
    %145 = vector.extract_strided_slice %139 {offsets = [0, 256], sizes = [16, 128], strides = [1, 1]} : vector<16x384xf32> to vector<16x128xf32>
    %146 = vector.extract_strided_slice %142 {offsets = [0, 0], sizes = [16, 128], strides = [1, 1]} : vector<16x384xf32> to vector<16x128xf32>
    %147 = vector.extract_strided_slice %142 {offsets = [0, 128], sizes = [16, 128], strides = [1, 1]} : vector<16x384xf32> to vector<16x128xf32>
    %148 = vector.extract_strided_slice %142 {offsets = [0, 256], sizes = [16, 128], strides = [1, 1]} : vector<16x384xf32> to vector<16x128xf32>
    %c0_58 = arith.constant 0 : index
    %c0_59 = arith.constant 0 : index
    %149 = vector.load %arg6[%c0_58, %c0_59] : memref<1x128xf32, #tpu.memory_space<vmem>>, vector<1x128xf32>
    %150 = vector.broadcast %149 : vector<1x128xf32> to vector<16x128xf32>
    %151 = arith.addf %148, %150 : vector<16x128xf32>
    %152 = arith.addf %143, %146 : vector<16x128xf32>
    %153 = arith.negf %152 : vector<16x128xf32>
    %154 = math.exp %153 : vector<16x128xf32>
    %cst_60 = arith.constant 1.000000e+00 : f32
    %155 = vector.broadcast %cst_60 : f32 to vector<16x128xf32>
    %156 = arith.addf %155, %154 : vector<16x128xf32>
    %157 = arith.divf %155, %156 : vector<16x128xf32>
    %158 = arith.addf %144, %147 : vector<16x128xf32>
    %159 = arith.negf %158 : vector<16x128xf32>
    %160 = math.exp %159 : vector<16x128xf32>
    %cst_61 = arith.constant 1.000000e+00 : f32
    %161 = vector.broadcast %cst_61 : f32 to vector<16x128xf32>
    %162 = arith.addf %161, %160 : vector<16x128xf32>
    %163 = arith.divf %161, %162 : vector<16x128xf32>
    %164 = arith.mulf %157, %151 : vector<16x128xf32>
    %165 = arith.addf %145, %164 : vector<16x128xf32>
    %166 = math.tanh %165 : vector<16x128xf32>
    %167 = arith.subf %135, %166 : vector<16x128xf32>
    %168 = arith.mulf %163, %167 : vector<16x128xf32>
    %169 = arith.addf %166, %168 : vector<16x128xf32>
    %170 = arith.index_cast %c3_i32 : i32 to index
    %c0_62 = arith.constant 0 : index
    %c0_63 = arith.constant 0 : index
    %171 = vector.load %arg7[%170, %c0_62, %c0_63] : memref<8x16x128xf32, #tpu.memory_space<vmem>>, vector<1x16x128xf32>
    %172 = vector.shape_cast %171 : vector<1x16x128xf32> to vector<16x128xf32>
    %173 = vector.shape_cast %169 : vector<16x128xf32> to vector<1x16x128xf32>
    tpu.vector_store %arg7[%170, %c0_62, %c0_63], %173 {strides = array<i32>} : memref<8x16x128xf32, #tpu.memory_space<vmem>>, vector<1x16x128xf32>,
    %174 = arith.index_cast %c3_i32 : i32 to index
    %c0_64 = arith.constant 0 : index
    %c0_65 = arith.constant 0 : index
    %175 = vector.load %arg3[%174, %c0_64, %c0_65] : memref<8x16x128xf32, #tpu.memory_space<vmem>>, vector<1x16x128xf32>
    %176 = vector.shape_cast %175 : vector<1x16x128xf32> to vector<16x128xf32>
    %177 = arith.addf %169, %176 : vector<16x128xf32>
    %c0_66 = arith.constant 0 : index
    %c0_67 = arith.constant 0 : index
    %178 = vector.load %arg8[%c0_66, %c0_67] : memref<16x128xf32, #tpu.memory_space<vmem>>, vector<16x128xf32>
    tpu.vector_store %arg8[%c0_66, %c0_67], %177 {strides = array<i32>} : memref<16x128xf32, #tpu.memory_space<vmem>>, vector<16x128xf32>,
    %c4_i32 = arith.constant 4 : i32
    %c0_68 = arith.constant 0 : index
    %c0_69 = arith.constant 0 : index
    %179 = vector.load %arg8[%c0_68, %c0_69] : memref<16x128xf32, #tpu.memory_space<vmem>>, vector<16x128xf32>
    %180 = arith.index_cast %c4_i32 : i32 to index
    %c0_70 = arith.constant 0 : index
    %c0_71 = arith.constant 0 : index
    %181 = vector.load %arg2[%180, %c0_70, %c0_71] : memref<8x16x384xbf16, #tpu.memory_space<vmem>>, vector<1x16x384xbf16>
    %182 = vector.shape_cast %181 : vector<1x16x384xbf16> to vector<16x384xbf16>
    %183 = arith.extf %182 : vector<16x384xbf16> to vector<16x384xf32>
    %184 = arith.truncf %179 : vector<16x128xf32> to vector<16x128xbf16>
    %c0_72 = arith.constant 0 : index
    %c0_73 = arith.constant 0 : index
    %185 = vector.load %arg5[%c0_72, %c0_73] : memref<128x384xbf16, #tpu.memory_space<vmem>>, vector<128x384xbf16>
    %cst_74 = arith.constant dense<0.000000e+00> : vector<16x384xf32>
    %186 = tpu.matmul %184, %185, %cst_74 {dimension_numbers = #tpu.dot_dimension_numbers<[1], [0], [0], [1], [0, 0, 1, 1], [], []>} : vector<16x128xbf16>, vector<128x384xbf16>, vector<16x384xf32> -> vector<16x384xf32>
    %187 = vector.extract_strided_slice %183 {offsets = [0, 0], sizes = [16, 128], strides = [1, 1]} : vector<16x384xf32> to vector<16x128xf32>
    %188 = vector.extract_strided_slice %183 {offsets = [0, 128], sizes = [16, 128], strides = [1, 1]} : vector<16x384xf32> to vector<16x128xf32>
    %189 = vector.extract_strided_slice %183 {offsets = [0, 256], sizes = [16, 128], strides = [1, 1]} : vector<16x384xf32> to vector<16x128xf32>
    %190 = vector.extract_strided_slice %186 {offsets = [0, 0], sizes = [16, 128], strides = [1, 1]} : vector<16x384xf32> to vector<16x128xf32>
    %191 = vector.extract_strided_slice %186 {offsets = [0, 128], sizes = [16, 128], strides = [1, 1]} : vector<16x384xf32> to vector<16x128xf32>
    %192 = vector.extract_strided_slice %186 {offsets = [0, 256], sizes = [16, 128], strides = [1, 1]} : vector<16x384xf32> to vector<16x128xf32>
    %c0_75 = arith.constant 0 : index
    %c0_76 = arith.constant 0 : index
    %193 = vector.load %arg6[%c0_75, %c0_76] : memref<1x128xf32, #tpu.memory_space<vmem>>, vector<1x128xf32>
    %194 = vector.broadcast %193 : vector<1x128xf32> to vector<16x128xf32>
    %195 = arith.addf %192, %194 : vector<16x128xf32>
    %196 = arith.addf %187, %190 : vector<16x128xf32>
    %197 = arith.negf %196 : vector<16x128xf32>
    %198 = math.exp %197 : vector<16x128xf32>
    %cst_77 = arith.constant 1.000000e+00 : f32
    %199 = vector.broadcast %cst_77 : f32 to vector<16x128xf32>
    %200 = arith.addf %199, %198 : vector<16x128xf32>
    %201 = arith.divf %199, %200 : vector<16x128xf32>
    %202 = arith.addf %188, %191 : vector<16x128xf32>
    %203 = arith.negf %202 : vector<16x128xf32>
    %204 = math.exp %203 : vector<16x128xf32>
    %cst_78 = arith.constant 1.000000e+00 : f32
    %205 = vector.broadcast %cst_78 : f32 to vector<16x128xf32>
    %206 = arith.addf %205, %204 : vector<16x128xf32>
    %207 = arith.divf %205, %206 : vector<16x128xf32>
    %208 = arith.mulf %201, %195 : vector<16x128xf32>
    %209 = arith.addf %189, %208 : vector<16x128xf32>
    %210 = math.tanh %209 : vector<16x128xf32>
    %211 = arith.subf %179, %210 : vector<16x128xf32>
    %212 = arith.mulf %207, %211 : vector<16x128xf32>
    %213 = arith.addf %210, %212 : vector<16x128xf32>
    %214 = arith.index_cast %c4_i32 : i32 to index
    %c0_79 = arith.constant 0 : index
    %c0_80 = arith.constant 0 : index
    %215 = vector.load %arg7[%214, %c0_79, %c0_80] : memref<8x16x128xf32, #tpu.memory_space<vmem>>, vector<1x16x128xf32>
    %216 = vector.shape_cast %215 : vector<1x16x128xf32> to vector<16x128xf32>
    %217 = vector.shape_cast %213 : vector<16x128xf32> to vector<1x16x128xf32>
    tpu.vector_store %arg7[%214, %c0_79, %c0_80], %217 {strides = array<i32>} : memref<8x16x128xf32, #tpu.memory_space<vmem>>, vector<1x16x128xf32>,
    %218 = arith.index_cast %c4_i32 : i32 to index
    %c0_81 = arith.constant 0 : index
    %c0_82 = arith.constant 0 : index
    %219 = vector.load %arg3[%218, %c0_81, %c0_82] : memref<8x16x128xf32, #tpu.memory_space<vmem>>, vector<1x16x128xf32>
    %220 = vector.shape_cast %219 : vector<1x16x128xf32> to vector<16x128xf32>
    %221 = arith.addf %213, %220 : vector<16x128xf32>
    %c0_83 = arith.constant 0 : index
    %c0_84 = arith.constant 0 : index
    %222 = vector.load %arg8[%c0_83, %c0_84] : memref<16x128xf32, #tpu.memory_space<vmem>>, vector<16x128xf32>
    tpu.vector_store %arg8[%c0_83, %c0_84], %221 {strides = array<i32>} : memref<16x128xf32, #tpu.memory_space<vmem>>, vector<16x128xf32>,
    %c5_i32 = arith.constant 5 : i32
    %c0_85 = arith.constant 0 : index
    %c0_86 = arith.constant 0 : index
    %223 = vector.load %arg8[%c0_85, %c0_86] : memref<16x128xf32, #tpu.memory_space<vmem>>, vector<16x128xf32>
    %224 = arith.index_cast %c5_i32 : i32 to index
    %c0_87 = arith.constant 0 : index
    %c0_88 = arith.constant 0 : index
    %225 = vector.load %arg2[%224, %c0_87, %c0_88] : memref<8x16x384xbf16, #tpu.memory_space<vmem>>, vector<1x16x384xbf16>
    %226 = vector.shape_cast %225 : vector<1x16x384xbf16> to vector<16x384xbf16>
    %227 = arith.extf %226 : vector<16x384xbf16> to vector<16x384xf32>
    %228 = arith.truncf %223 : vector<16x128xf32> to vector<16x128xbf16>
    %c0_89 = arith.constant 0 : index
    %c0_90 = arith.constant 0 : index
    %229 = vector.load %arg5[%c0_89, %c0_90] : memref<128x384xbf16, #tpu.memory_space<vmem>>, vector<128x384xbf16>
    %cst_91 = arith.constant dense<0.000000e+00> : vector<16x384xf32>
    %230 = tpu.matmul %228, %229, %cst_91 {dimension_numbers = #tpu.dot_dimension_numbers<[1], [0], [0], [1], [0, 0, 1, 1], [], []>} : vector<16x128xbf16>, vector<128x384xbf16>, vector<16x384xf32> -> vector<16x384xf32>
    %231 = vector.extract_strided_slice %227 {offsets = [0, 0], sizes = [16, 128], strides = [1, 1]} : vector<16x384xf32> to vector<16x128xf32>
    %232 = vector.extract_strided_slice %227 {offsets = [0, 128], sizes = [16, 128], strides = [1, 1]} : vector<16x384xf32> to vector<16x128xf32>
    %233 = vector.extract_strided_slice %227 {offsets = [0, 256], sizes = [16, 128], strides = [1, 1]} : vector<16x384xf32> to vector<16x128xf32>
    %234 = vector.extract_strided_slice %230 {offsets = [0, 0], sizes = [16, 128], strides = [1, 1]} : vector<16x384xf32> to vector<16x128xf32>
    %235 = vector.extract_strided_slice %230 {offsets = [0, 128], sizes = [16, 128], strides = [1, 1]} : vector<16x384xf32> to vector<16x128xf32>
    %236 = vector.extract_strided_slice %230 {offsets = [0, 256], sizes = [16, 128], strides = [1, 1]} : vector<16x384xf32> to vector<16x128xf32>
    %c0_92 = arith.constant 0 : index
    %c0_93 = arith.constant 0 : index
    %237 = vector.load %arg6[%c0_92, %c0_93] : memref<1x128xf32, #tpu.memory_space<vmem>>, vector<1x128xf32>
    %238 = vector.broadcast %237 : vector<1x128xf32> to vector<16x128xf32>
    %239 = arith.addf %236, %238 : vector<16x128xf32>
    %240 = arith.addf %231, %234 : vector<16x128xf32>
    %241 = arith.negf %240 : vector<16x128xf32>
    %242 = math.exp %241 : vector<16x128xf32>
    %cst_94 = arith.constant 1.000000e+00 : f32
    %243 = vector.broadcast %cst_94 : f32 to vector<16x128xf32>
    %244 = arith.addf %243, %242 : vector<16x128xf32>
    %245 = arith.divf %243, %244 : vector<16x128xf32>
    %246 = arith.addf %232, %235 : vector<16x128xf32>
    %247 = arith.negf %246 : vector<16x128xf32>
    %248 = math.exp %247 : vector<16x128xf32>
    %cst_95 = arith.constant 1.000000e+00 : f32
    %249 = vector.broadcast %cst_95 : f32 to vector<16x128xf32>
    %250 = arith.addf %249, %248 : vector<16x128xf32>
    %251 = arith.divf %249, %250 : vector<16x128xf32>
    %252 = arith.mulf %245, %239 : vector<16x128xf32>
    %253 = arith.addf %233, %252 : vector<16x128xf32>
    %254 = math.tanh %253 : vector<16x128xf32>
    %255 = arith.subf %223, %254 : vector<16x128xf32>
    %256 = arith.mulf %251, %255 : vector<16x128xf32>
    %257 = arith.addf %254, %256 : vector<16x128xf32>
    %258 = arith.index_cast %c5_i32 : i32 to index
    %c0_96 = arith.constant 0 : index
    %c0_97 = arith.constant 0 : index
    %259 = vector.load %arg7[%258, %c0_96, %c0_97] : memref<8x16x128xf32, #tpu.memory_space<vmem>>, vector<1x16x128xf32>
    %260 = vector.shape_cast %259 : vector<1x16x128xf32> to vector<16x128xf32>
    %261 = vector.shape_cast %257 : vector<16x128xf32> to vector<1x16x128xf32>
    tpu.vector_store %arg7[%258, %c0_96, %c0_97], %261 {strides = array<i32>} : memref<8x16x128xf32, #tpu.memory_space<vmem>>, vector<1x16x128xf32>,
    %262 = arith.index_cast %c5_i32 : i32 to index
    %c0_98 = arith.constant 0 : index
    %c0_99 = arith.constant 0 : index
    %263 = vector.load %arg3[%262, %c0_98, %c0_99] : memref<8x16x128xf32, #tpu.memory_space<vmem>>, vector<1x16x128xf32>
    %264 = vector.shape_cast %263 : vector<1x16x128xf32> to vector<16x128xf32>
    %265 = arith.addf %257, %264 : vector<16x128xf32>
    %c0_100 = arith.constant 0 : index
    %c0_101 = arith.constant 0 : index
    %266 = vector.load %arg8[%c0_100, %c0_101] : memref<16x128xf32, #tpu.memory_space<vmem>>, vector<16x128xf32>
    tpu.vector_store %arg8[%c0_100, %c0_101], %265 {strides = array<i32>} : memref<16x128xf32, #tpu.memory_space<vmem>>, vector<16x128xf32>,
    %c6_i32 = arith.constant 6 : i32
    %c0_102 = arith.constant 0 : index
    %c0_103 = arith.constant 0 : index
    %267 = vector.load %arg8[%c0_102, %c0_103] : memref<16x128xf32, #tpu.memory_space<vmem>>, vector<16x128xf32>
    %268 = arith.index_cast %c6_i32 : i32 to index
    %c0_104 = arith.constant 0 : index
    %c0_105 = arith.constant 0 : index
    %269 = vector.load %arg2[%268, %c0_104, %c0_105] : memref<8x16x384xbf16, #tpu.memory_space<vmem>>, vector<1x16x384xbf16>
    %270 = vector.shape_cast %269 : vector<1x16x384xbf16> to vector<16x384xbf16>
    %271 = arith.extf %270 : vector<16x384xbf16> to vector<16x384xf32>
    %272 = arith.truncf %267 : vector<16x128xf32> to vector<16x128xbf16>
    %c0_106 = arith.constant 0 : index
    %c0_107 = arith.constant 0 : index
    %273 = vector.load %arg5[%c0_106, %c0_107] : memref<128x384xbf16, #tpu.memory_space<vmem>>, vector<128x384xbf16>
    %cst_108 = arith.constant dense<0.000000e+00> : vector<16x384xf32>
    %274 = tpu.matmul %272, %273, %cst_108 {dimension_numbers = #tpu.dot_dimension_numbers<[1], [0], [0], [1], [0, 0, 1, 1], [], []>} : vector<16x128xbf16>, vector<128x384xbf16>, vector<16x384xf32> -> vector<16x384xf32>
    %275 = vector.extract_strided_slice %271 {offsets = [0, 0], sizes = [16, 128], strides = [1, 1]} : vector<16x384xf32> to vector<16x128xf32>
    %276 = vector.extract_strided_slice %271 {offsets = [0, 128], sizes = [16, 128], strides = [1, 1]} : vector<16x384xf32> to vector<16x128xf32>
    %277 = vector.extract_strided_slice %271 {offsets = [0, 256], sizes = [16, 128], strides = [1, 1]} : vector<16x384xf32> to vector<16x128xf32>
    %278 = vector.extract_strided_slice %274 {offsets = [0, 0], sizes = [16, 128], strides = [1, 1]} : vector<16x384xf32> to vector<16x128xf32>
    %279 = vector.extract_strided_slice %274 {offsets = [0, 128], sizes = [16, 128], strides = [1, 1]} : vector<16x384xf32> to vector<16x128xf32>
    %280 = vector.extract_strided_slice %274 {offsets = [0, 256], sizes = [16, 128], strides = [1, 1]} : vector<16x384xf32> to vector<16x128xf32>
    %c0_109 = arith.constant 0 : index
    %c0_110 = arith.constant 0 : index
    %281 = vector.load %arg6[%c0_109, %c0_110] : memref<1x128xf32, #tpu.memory_space<vmem>>, vector<1x128xf32>
    %282 = vector.broadcast %281 : vector<1x128xf32> to vector<16x128xf32>
    %283 = arith.addf %280, %282 : vector<16x128xf32>
    %284 = arith.addf %275, %278 : vector<16x128xf32>
    %285 = arith.negf %284 : vector<16x128xf32>
    %286 = math.exp %285 : vector<16x128xf32>
    %cst_111 = arith.constant 1.000000e+00 : f32
    %287 = vector.broadcast %cst_111 : f32 to vector<16x128xf32>
    %288 = arith.addf %287, %286 : vector<16x128xf32>
    %289 = arith.divf %287, %288 : vector<16x128xf32>
    %290 = arith.addf %276, %279 : vector<16x128xf32>
    %291 = arith.negf %290 : vector<16x128xf32>
    %292 = math.exp %291 : vector<16x128xf32>
    %cst_112 = arith.constant 1.000000e+00 : f32
    %293 = vector.broadcast %cst_112 : f32 to vector<16x128xf32>
    %294 = arith.addf %293, %292 : vector<16x128xf32>
    %295 = arith.divf %293, %294 : vector<16x128xf32>
    %296 = arith.mulf %289, %283 : vector<16x128xf32>
    %297 = arith.addf %277, %296 : vector<16x128xf32>
    %298 = math.tanh %297 : vector<16x128xf32>
    %299 = arith.subf %267, %298 : vector<16x128xf32>
    %300 = arith.mulf %295, %299 : vector<16x128xf32>
    %301 = arith.addf %298, %300 : vector<16x128xf32>
    %302 = arith.index_cast %c6_i32 : i32 to index
    %c0_113 = arith.constant 0 : index
    %c0_114 = arith.constant 0 : index
    %303 = vector.load %arg7[%302, %c0_113, %c0_114] : memref<8x16x128xf32, #tpu.memory_space<vmem>>, vector<1x16x128xf32>
    %304 = vector.shape_cast %303 : vector<1x16x128xf32> to vector<16x128xf32>
    %305 = vector.shape_cast %301 : vector<16x128xf32> to vector<1x16x128xf32>
    tpu.vector_store %arg7[%302, %c0_113, %c0_114], %305 {strides = array<i32>} : memref<8x16x128xf32, #tpu.memory_space<vmem>>, vector<1x16x128xf32>,
    %306 = arith.index_cast %c6_i32 : i32 to index
    %c0_115 = arith.constant 0 : index
    %c0_116 = arith.constant 0 : index
    %307 = vector.load %arg3[%306, %c0_115, %c0_116] : memref<8x16x128xf32, #tpu.memory_space<vmem>>, vector<1x16x128xf32>
    %308 = vector.shape_cast %307 : vector<1x16x128xf32> to vector<16x128xf32>
    %309 = arith.addf %301, %308 : vector<16x128xf32>
    %c0_117 = arith.constant 0 : index
    %c0_118 = arith.constant 0 : index
    %310 = vector.load %arg8[%c0_117, %c0_118] : memref<16x128xf32, #tpu.memory_space<vmem>>, vector<16x128xf32>
    tpu.vector_store %arg8[%c0_117, %c0_118], %309 {strides = array<i32>} : memref<16x128xf32, #tpu.memory_space<vmem>>, vector<16x128xf32>,
    %c7_i32 = arith.constant 7 : i32
    %c0_119 = arith.constant 0 : index
    %c0_120 = arith.constant 0 : index
    %311 = vector.load %arg8[%c0_119, %c0_120] : memref<16x128xf32, #tpu.memory_space<vmem>>, vector<16x128xf32>
    %312 = arith.index_cast %c7_i32 : i32 to index
    %c0_121 = arith.constant 0 : index
    %c0_122 = arith.constant 0 : index
    %313 = vector.load %arg2[%312, %c0_121, %c0_122] : memref<8x16x384xbf16, #tpu.memory_space<vmem>>, vector<1x16x384xbf16>
    %314 = vector.shape_cast %313 : vector<1x16x384xbf16> to vector<16x384xbf16>
    %315 = arith.extf %314 : vector<16x384xbf16> to vector<16x384xf32>
    %316 = arith.truncf %311 : vector<16x128xf32> to vector<16x128xbf16>
    %c0_123 = arith.constant 0 : index
    %c0_124 = arith.constant 0 : index
    %317 = vector.load %arg5[%c0_123, %c0_124] : memref<128x384xbf16, #tpu.memory_space<vmem>>, vector<128x384xbf16>
    %cst_125 = arith.constant dense<0.000000e+00> : vector<16x384xf32>
    %318 = tpu.matmul %316, %317, %cst_125 {dimension_numbers = #tpu.dot_dimension_numbers<[1], [0], [0], [1], [0, 0, 1, 1], [], []>} : vector<16x128xbf16>, vector<128x384xbf16>, vector<16x384xf32> -> vector<16x384xf32>
    %319 = vector.extract_strided_slice %315 {offsets = [0, 0], sizes = [16, 128], strides = [1, 1]} : vector<16x384xf32> to vector<16x128xf32>
    %320 = vector.extract_strided_slice %315 {offsets = [0, 128], sizes = [16, 128], strides = [1, 1]} : vector<16x384xf32> to vector<16x128xf32>
    %321 = vector.extract_strided_slice %315 {offsets = [0, 256], sizes = [16, 128], strides = [1, 1]} : vector<16x384xf32> to vector<16x128xf32>
    %322 = vector.extract_strided_slice %318 {offsets = [0, 0], sizes = [16, 128], strides = [1, 1]} : vector<16x384xf32> to vector<16x128xf32>
    %323 = vector.extract_strided_slice %318 {offsets = [0, 128], sizes = [16, 128], strides = [1, 1]} : vector<16x384xf32> to vector<16x128xf32>
    %324 = vector.extract_strided_slice %318 {offsets = [0, 256], sizes = [16, 128], strides = [1, 1]} : vector<16x384xf32> to vector<16x128xf32>
    %c0_126 = arith.constant 0 : index
    %c0_127 = arith.constant 0 : index
    %325 = vector.load %arg6[%c0_126, %c0_127] : memref<1x128xf32, #tpu.memory_space<vmem>>, vector<1x128xf32>
    %326 = vector.broadcast %325 : vector<1x128xf32> to vector<16x128xf32>
    %327 = arith.addf %324, %326 : vector<16x128xf32>
    %328 = arith.addf %319, %322 : vector<16x128xf32>
    %329 = arith.negf %328 : vector<16x128xf32>
    %330 = math.exp %329 : vector<16x128xf32>
    %cst_128 = arith.constant 1.000000e+00 : f32
    %331 = vector.broadcast %cst_128 : f32 to vector<16x128xf32>
    %332 = arith.addf %331, %330 : vector<16x128xf32>
    %333 = arith.divf %331, %332 : vector<16x128xf32>
    %334 = arith.addf %320, %323 : vector<16x128xf32>
    %335 = arith.negf %334 : vector<16x128xf32>
    %336 = math.exp %335 : vector<16x128xf32>
    %cst_129 = arith.constant 1.000000e+00 : f32
    %337 = vector.broadcast %cst_129 : f32 to vector<16x128xf32>
    %338 = arith.addf %337, %336 : vector<16x128xf32>
    %339 = arith.divf %337, %338 : vector<16x128xf32>
    %340 = arith.mulf %333, %327 : vector<16x128xf32>
    %341 = arith.addf %321, %340 : vector<16x128xf32>
    %342 = math.tanh %341 : vector<16x128xf32>
    %343 = arith.subf %311, %342 : vector<16x128xf32>
    %344 = arith.mulf %339, %343 : vector<16x128xf32>
    %345 = arith.addf %342, %344 : vector<16x128xf32>
    %346 = arith.index_cast %c7_i32 : i32 to index
    %c0_130 = arith.constant 0 : index
    %c0_131 = arith.constant 0 : index
    %347 = vector.load %arg7[%346, %c0_130, %c0_131] : memref<8x16x128xf32, #tpu.memory_space<vmem>>, vector<1x16x128xf32>
    %348 = vector.shape_cast %347 : vector<1x16x128xf32> to vector<16x128xf32>
    %349 = vector.shape_cast %345 : vector<16x128xf32> to vector<1x16x128xf32>
    tpu.vector_store %arg7[%346, %c0_130, %c0_131], %349 {strides = array<i32>} : memref<8x16x128xf32, #tpu.memory_space<vmem>>, vector<1x16x128xf32>,
    %350 = arith.index_cast %c7_i32 : i32 to index
    %c0_132 = arith.constant 0 : index
    %c0_133 = arith.constant 0 : index
    %351 = vector.load %arg3[%350, %c0_132, %c0_133] : memref<8x16x128xf32, #tpu.memory_space<vmem>>, vector<1x16x128xf32>
    %352 = vector.shape_cast %351 : vector<1x16x128xf32> to vector<16x128xf32>
    %353 = arith.addf %345, %352 : vector<16x128xf32>
    %c0_134 = arith.constant 0 : index
    %c0_135 = arith.constant 0 : index
    %354 = vector.load %arg8[%c0_134, %c0_135] : memref<16x128xf32, #tpu.memory_space<vmem>>, vector<16x128xf32>
    tpu.vector_store %arg8[%c0_134, %c0_135], %353 {strides = array<i32>} : memref<16x128xf32, #tpu.memory_space<vmem>>, vector<16x128xf32>,
    %c8_i32 = arith.constant 8 : i32
    return
  }
  func.func @transform_0(%arg0: i32, %arg1: i32) -> (i32, i32, i32) {
    %c0_i32 = arith.constant 0 : i32
    %c0_i32_0 = arith.constant 0 : i32
    return %arg1, %arg0, %c0_i32 : i32, i32, i32
  }
  func.func @transform_1(%arg0: i32, %arg1: i32) -> (i32, i32, i32) {
    %c0_i32 = arith.constant 0 : i32
    %c0_i32_0 = arith.constant 0 : i32
    return %arg1, %arg0, %c0_i32 : i32, i32, i32
  }
  func.func @transform_2(%arg0: i32, %arg1: i32) -> (i32, i32) {
    %c0_i32 = arith.constant 0 : i32
    %c0_i32_0 = arith.constant 0 : i32
    return %arg0, %c0_i32 : i32, i32
  }
  func.func @transform_3(%arg0: i32, %arg1: i32) -> (i32, i32) {
    %c0_i32 = arith.constant 0 : i32
    %c0_i32_0 = arith.constant 0 : i32
    %c0_i32_1 = arith.constant 0 : i32
    return %c0_i32, %c0_i32_0 : i32, i32
  }
  func.func @transform_4(%arg0: i32, %arg1: i32) -> (i32, i32) {
    %c0_i32 = arith.constant 0 : i32
    %c0_i32_0 = arith.constant 0 : i32
    %c0_i32_1 = arith.constant 0 : i32
    return %c0_i32, %c0_i32_0 : i32, i32
  }
  func.func @transform_5(%arg0: i32, %arg1: i32) -> (i32, i32, i32) {
    %c0_i32 = arith.constant 0 : i32
    %c0_i32_0 = arith.constant 0 : i32
    return %arg1, %arg0, %c0_i32 : i32, i32, i32
  }
}

</mosaic_0001>

<bundles_post_ra>
// kernel: noisy_gru_sequence.1
= control target key start
LH: loop header
LB: loop body
LE: loop exit
PB: predicated region body
PF: predicated region fallthrough
CT: control target
= control target key end

     0   :  { %v3361_v1 = vmov 0.0   ;;  %v3362_v2 = vmov 0   ;;  %vm3363_vm0 = vmmov 0   ;;  %s4216_s3 = inlined_call_operand.vmem [shape: bf16[128,384], index: 3, kind: input, shape index: {}]   ;;  %s4217_s2 = inlined_call_operand.vmem [shape: f32[16,128], index: 2, kind: input, shape index: {}]   ;;  %s4218_s0 = inlined_call_operand.vmem [shape: bf16[8,16,384], index: 0, kind: input, shape index: {}]   ;;  %s4219_s4 = inlined_call_operand.vmem [shape: f32[1,128], index: 4, kind: input, shape index: {}]   ;;  %s4220_s1 = inlined_call_operand.vmem [shape: f32[8,16,128], index: 1, kind: input, shape index: {}]   ;;  %s4221_s5 = inlined_call_operand.vmem [shape: f32[8,16,128], index: 5, kind: output, shape index: {}]  }
   0x1   :  { %v3397_v0 = vld [vmem:[%s4216_s3 + $0x4] ss:$12 sps:$4 sm:$0xff]   ;;  %2926 = vmatprep.subr.bf16.mxu1 %v3361_v1  ;;  %234 = vmatprep.mubr.bf16.mxu0 %v3362_v2  ;;  %v3404_v3 = vld [vmem:[%s4216_s3] ss:$12 sps:$4 sm:$0xff]   ;;  %v3412_v4 = vld [vmem:[%s4216_s3 + $0x1c] ss:$12 sps:$4 sm:$0xff]  }
   0x2   :  { %2942 = vmatprep.mubr.msk.bf16.mxu1 %vm3363_vm0, %v3361_v1  ;;  %202 = vmatprep.subr.bf16.mxu0 %v3397_v0  ;;  %v3418_v5 = vld [vmem:[%s4216_s3 + $0x18] ss:$12 sps:$4 sm:$0xff]   ;;  %v3424_v6 = vld [vmem:[%s4216_s3 + $0x34] ss:$12 sps:$4 sm:$0xff]   ;;  %v3430_v7 = vld [vmem:[%s4216_s3 + $0x30] ss:$12 sps:$4 sm:$0xff]  }
   0x3   :  { %203 = vmatpush1.bf16.msra.mxu0 %v3404_v3  ;;  %v3436_v8 = vld [vmem:[%s4216_s3 + $0x4c] ss:$12 sps:$4 sm:$0xff]   ;;  %v3109_v9 = vld [vmem:[%s4216_s3 + $0x8] ss:$12 sps:$4 sm:$0xff]   ;;  %v3451_v11 = vld [vmem:[%s4216_s3 + $0x64] ss:$12 sps:$4 sm:$0xff]  }
   0x4   :  { %204 = vmatprep.subr.bf16.mxu0 %v3412_v4  ;;  %v3445_v10 = vld [vmem:[%s4216_s3 + $0x48] ss:$12 sps:$4 sm:$0xff]   ;;  %2927 = vmatpush3.bf16.msra.mxu1 %v3109_v9  ;;  %v3113_v12 = vld [vmem:[%s4216_s3 + $0x20] ss:$12 sps:$4 sm:$0xff]   ;;  %v3115_v14 = vld [vmem:[%s4216_s3 + $0x38] ss:$12 sps:$4 sm:$0xff]  }
   0x5   :  { %2928 = vmatprep.subr.bf16.mxu1 %v3361_v1  ;;  %v3460_v13 = vld [vmem:[%s4216_s3 + $0x60] ss:$12 sps:$4 sm:$0xff]   ;;  %v3470_v15 = vld [vmem:[%s4216_s3 + $0x7c] ss:$12 sps:$4 sm:$0xff]   ;;  %v3476_v16 = vld [vmem:[%s4216_s3 + $0x78] ss:$12 sps:$4 sm:$0xff]  }
   0x6   :  { %v3482_v17 = vld [vmem:[%s4216_s3 + $0x94] ss:$12 sps:$4 sm:$0xff]   ;;  %v3116_v18 = vld [vmem:[%s4216_s3 + $0x50] ss:$12 sps:$4 sm:$0xff]   ;;  %v3500_v21 = vld [vmem:[%s4216_s3 + $0xac] ss:$12 sps:$4 sm:$0xff]  }
   0x7   :  { %205 = vmatpush1.bf16.msra.mxu0 %v3418_v5  ;;  %v3492_v19 = vld [vmem:[%s4216_s3 + $0x90] ss:$12 sps:$4 sm:$0xff]   ;;  %v3117_v20 = vld [vmem:[%s4216_s3 + $0x68] ss:$12 sps:$4 sm:$0xff]   ;;  %v3513_v23 = vld [vmem:[%s4217_s2] sm:$0xff] }
   0x8   :  { %206 = vmatprep.subr.bf16.mxu0 %v3424_v6  ;;  %2929 = vmatpush3.bf16.msra.mxu1 %v3113_v12  ;;  %v3508_v22 = vld [vmem:[%s4216_s3 + $0xa8] ss:$12 sps:$4 sm:$0xff]   ;;  %v3118_v25 = vld [vmem:[%s4216_s3 + $0x80] ss:$12 sps:$4 sm:$0xff]   ;;  %v3119_v26 = vld [vmem:[%s4216_s3 + $0x98] ss:$12 sps:$4 sm:$0xff]  }
   0x9   :  { %2930 = vmatprep.subr.bf16.mxu1 %v3361_v1  ;;  %v3518_v24 = vld [vmem:[%s4217_s2 + $0x8] sm:$0xff]  ;;  %v3120_v28 = vld [vmem:[%s4216_s3 + $0xb0] ss:$12 sps:$4 sm:$0xff]   ;;  %v3123_v31 = vld [vmem:[%s4216_s3 + $0x38] ss:$12 sps:$4 sm:$0xff]  }
   0xa   :  { %v41_v27 = vpack.c.bf16 %v3518_v24, %v3513_v23  ;;  %v3121_v29 = vld [vmem:[%s4216_s3 + $0x8] ss:$12 sps:$4 sm:$0xff]   ;;  %v3122_v30 = vld [vmem:[%s4216_s3 + $0x20] ss:$12 sps:$4 sm:$0xff]   ;;  %v3124_v32 = vld [vmem:[%s4216_s3 + $0x50] ss:$12 sps:$4 sm:$0xff]  }
   0xb   :  { %207 = vmatpush1.bf16.msra.mxu0 %v3430_v7  ;;  %v3125_v33 = vld [vmem:[%s4216_s3 + $0x68] ss:$12 sps:$4 sm:$0xff]   ;;  %v3126_v34 = vld [vmem:[%s4216_s3 + $0x80] ss:$12 sps:$4 sm:$0xff]   ;;  %v3127_v35 = vld [vmem:[%s4216_s3 + $0x98] ss:$12 sps:$4 sm:$0xff]  }
   0xc   :  { %208 = vmatprep.subr.bf16.mxu0 %v3436_v8  ;;  %2931 = vmatpush3.bf16.msra.mxu1 %v3115_v14  ;;  %v3128_v36 = vld [vmem:[%s4216_s3 + $0xb0] ss:$12 sps:$4 sm:$0xff]   ;;  %v31_v37 = vld [vmem:[%s4218_s0] sm:$0xff]  ;;  %v32_v9 = vld [vmem:[%s4218_s0 + $0x8] ss:$12 sps:$4 sm:$0xff]  }
   0xd   :  { %2932 = vmatprep.subr.bf16.mxu1 %v3361_v1  ;;  %v33_v38 = vld [vmem:[%s4218_s0 + $0xc] sm:$0xff]  ;;  %v35_v39 = vunpack.c.l.bf16 %v31_v37  ;;  %v36_v48 = vunpack.c.h.bf16 %v31_v37  ;;  %v3599_v63 = vld [vmem:[%s4219_s4] ss:$0 sm:$0xff] }
   0xe   :  { %v38_v40 = vunpack.c.l.bf16 %v33_v38  ;;  %v39_v50 = vunpack.c.h.bf16 %v33_v38 }
   0xf   :  { %209 = vmatpush1.bf16.msra.mxu0 %v3445_v10 }
  0x10   :  { %210 = vmatprep.subr.bf16.mxu0 %v3451_v11  ;;  %2933 = vmatpush3.bf16.msra.mxu1 %v3116_v18  ;;  %v37_v18 = vunpack.c.l.bf16 %v32_v9 }
  0x11   :  { %2934 = vmatprep.subr.bf16.mxu1 %v3361_v1 }
  0x13   :  { %211 = vmatpush1.bf16.msra.mxu0 %v3460_v13 }
  0x14   :  { %212 = vmatprep.subr.bf16.mxu0 %v3470_v15  ;;  %2935 = vmatpush3.bf16.msra.mxu1 %v3117_v20 }
  0x15   :  { %2936 = vmatprep.subr.bf16.mxu1 %v3361_v1 }
  0x17   :  { %213 = vmatpush1.bf16.msra.mxu0 %v3476_v16 }
  0x18   :  { %214 = vmatprep.subr.bf16.mxu0 %v3482_v17  ;;  %2937 = vmatpush3.bf16.msra.mxu1 %v3118_v25 }
  0x19   :  { %2938 = vmatprep.subr.bf16.mxu1 %v3361_v1 }
  0x1b   :  { %215 = vmatpush1.bf16.msra.mxu0 %v3492_v19 }
  0x1c   :  { %216 = vmatprep.subr.bf16.mxu0 %v3500_v21  ;;  %2939 = vmatpush3.bf16.msra.mxu1 %v3119_v26 }
  0x1d   :  { %2940 = vmatprep.subr.bf16.mxu1 %v3361_v1 }
  0x1f   :  { %217 = vmatpush1.bf16.msra.mxu0 %v3508_v22 }
  0x20   :  { %517 = vmatprep.subr.bf16.mxu0 %v3397_v0  ;;  %2941 = vmatpush3.bf16.msra.mxu1 %v3120_v28 }
  0x21   :  { %2946 = vmatprep.subr.bf16.mxu1 %v3361_v1 }
  0x22   :  { %235 = vmatmul.mubr.bf16.vlgmr.msra.gmra.mrb[0].mxu0 %v41_v27 }
  0x23   :  { %518 = vmatpush1.bf16.msra.mxu0 %v3404_v3  ;;  %549 = vmatprep.mubr.bf16.mxu0 %v3362_v2 }
  0x24   :  { %519 = vmatprep.subr.bf16.mxu0 %v3412_v4  ;;  %2943 = vmatmul.mubr.bf16.vlgmr.msra.gmra.mrb[0].mxu1 %v41_v27  ;;  %v40_v27 = vunpack.c.h.bf16 %v32_v9 }
  0x25   :  { %2962 = vmatprep.mubr.msk.bf16.mxu1 %vm3363_vm0, %v3361_v1  ;;  %2947 = vmatpush3.bf16.msra.mxu1 %v3121_v29 }
  0x26   :  { %2948 = vmatprep.subr.bf16.mxu1 %v3361_v1 }
  0x27   :  { %520 = vmatpush1.bf16.msra.mxu0 %v3418_v5 }
  0x28   :  { %521 = vmatprep.subr.bf16.mxu0 %v3424_v6 }
  0x29   :  { %2949 = vmatpush3.bf16.msra.mxu1 %v3122_v30 }
  0x2a   :  { %2950 = vmatprep.subr.bf16.mxu1 %v3361_v1 }
  0x2b   :  { %522 = vmatpush1.bf16.msra.mxu0 %v3430_v7 }
  0x2c   :  { %523 = vmatprep.subr.bf16.mxu0 %v3436_v8 }
  0x2d   :  { %2951 = vmatpush3.bf16.msra.mxu1 %v3123_v31 }
  0x2e   :  { %2952 = vmatprep.subr.bf16.mxu1 %v3361_v1 }
  0x2f   :  { %524 = vmatpush1.bf16.msra.mxu0 %v3445_v10 }
  0x30   :  { %525 = vmatprep.subr.bf16.mxu0 %v3451_v11 }
  0x31   :  { %2953 = vmatpush3.bf16.msra.mxu1 %v3124_v32 }
  0x32   :  { %2954 = vmatprep.subr.bf16.mxu1 %v3361_v1 }
  0x33   :  { %526 = vmatpush1.bf16.msra.mxu0 %v3460_v13 }
  0x34   :  { %527 = vmatprep.subr.bf16.mxu0 %v3470_v15 }
  0x35   :  { %2955 = vmatpush3.bf16.msra.mxu1 %v3125_v33 }
  0x36   :  { %2956 = vmatprep.subr.bf16.mxu1 %v3361_v1 }
  0x37   :  { %528 = vmatpush1.bf16.msra.mxu0 %v3476_v16 }
  0x38   :  { %529 = vmatprep.subr.bf16.mxu0 %v3482_v17 }
  0x39   :  { %2957 = vmatpush3.bf16.msra.mxu1 %v3126_v34 }
  0x3a   :  { %2958 = vmatprep.subr.bf16.mxu1 %v3361_v1 }
  0x3b   :  { %530 = vmatpush1.bf16.msra.mxu0 %v3492_v19 }
  0x3c   :  { %531 = vmatprep.subr.bf16.mxu0 %v3500_v21 }
  0x3d   :  { %2959 = vmatpush3.bf16.msra.mxu1 %v3127_v35 }
  0x3e   :  { %2960 = vmatprep.subr.bf16.mxu1 %v3361_v1 }
  0x3f   :  { %532 = vmatpush1.bf16.msra.mxu0 %v3508_v22 }
  0x40   :  { %834 = vmatprep.subr.bf16.mxu0 %v3397_v0 }
  0x41   :  { %2961 = vmatpush3.bf16.msra.mxu1 %v3128_v36 }
  0x42   :  { %2966 = vmatprep.subr.bf16.mxu1 %v3361_v1 }
  0xf5   :  { %v236_v41 = vpop.f32.mrb[0].mxu0 }
  0xf6   :  { %v295_v42 = vadd.f32 %v236_v41, %v35_v39  ;;  %v238_v43 = vpop.f32.mrb[1].mxu0 }
  0xf7   :  { %v240_v44 = vpop.f32.mrb[2].mxu0  ;;  %v279_v51 = vpop.f32.mrb[0].mxu1  ;;  %v309_v52 = vadd.f32 %v238_v43, %v36_v48  ;;  %v3129_v48 = vld [vmem:[%s4216_s3 + $0x8] ss:$12 sps:$4 sm:$0xff]  }
  0xf8   :  { %v2591_v45 = vmul.f32 -1.442695, %v295_v42  ;;  %v296_v46 = vadd.f32 %v240_v44, %v38_v40  ;;  %v242_v47 = vpop.f32.mrb[3].mxu0  ;;  %v2944_v53 = vpop.f32.mrb[1].mxu1  ;;  %v293_v12 = vadd.f32 %v3599_v63, %v279_v51  ;;  %v337_v44 = vld [vmem:[%s4220_s1] sm:$0xff] }
  0xf9   :  { %v282_v54 = vpop.f32.mrb[2].mxu1  ;;  %v310_v55 = vadd.f32 %v242_v47, %v39_v50  ;;  %v2593_v57 = vmul.f32 -1.442695, %v309_v52  ;;  %v3131_v50 = vld [vmem:[%s4216_s3 + $0x38] ss:$12 sps:$4 sm:$0xff]  }
  0xfa   :  { %3201 = vpow2.f32 %v2591_v45  ;;  %v2592_v49 = vmul.f32 -1.442695, %v296_v46  ;;  %v2945_v56 = vpop.f32.mrb[3].mxu1  ;;  %v294_v28 = vadd.f32 %v3599_v63, %v282_v54  ;;  %v338_v45 = vld [vmem:[%s4220_s1 + $0x8] sm:$0xff]  ;;  %v3135_v53 = vld [vmem:[%s4216_s3 + $0x98] ss:$12 sps:$4 sm:$0xff]  }
  0xfb   :  { %v2594_v59 = vmul.f32 -1.442695, %v310_v55  ;;  %v3133_v51 = vld [vmem:[%s4216_s3 + $0x68] ss:$12 sps:$4 sm:$0xff]   ;;  %v3134_v52 = vld [vmem:[%s4216_s3 + $0x80] ss:$12 sps:$4 sm:$0xff]  }
  0xfc   :  { %3203 = vpow2.f32 %v2592_v49  ;;  %v3130_v49 = vld [vmem:[%s4216_s3 + $0x20] ss:$12 sps:$4 sm:$0xff]   ;;  %v3136_v54 = vld [vmem:[%s4216_s3 + $0xb0] ss:$12 sps:$4 sm:$0xff]   ;;  %v2597_v56 = vld [vmem:[%s4218_s0 + $0x24] sm:$0xff] }
  0xfd   :  { %3205 = vpow2.f32 %v2593_v57  ;;  %v2595_v55 = vld [vmem:[%s4218_s0 + $0x18] sm:$0xff] }
  0xfe   :  { %v350_v57 = vunpack.c.l.bf16 %v2595_v55 }
 0x104   :  { %v3202_v58 = vpop.eup %3201 }
 0x105   :  { %v303_v60 = vadd.f32 1.0, %v3202_v58  ;;  %v353_v58 = vunpack.c.l.bf16 %v2597_v56 }
 0x106   :  { %v3204_v61 = vpop.eup %3203 }
 0x107   :  { %3207 = vrcp.f32 %v303_v60  ;;  %v304_v62 = vadd.f32 1.0, %v3204_v61  ;;  %v3206_v14 = vpop.eup %3205 }
 0x108   :  { %3209 = vpow2.f32 %v2594_v59  ;;  %v317_v30 = vadd.f32 1.0, %v3206_v14 }
 0x109   :  { %3211 = vrcp.f32 %v304_v62 }
 0x111   :  { %v3208_v20 = vpop.eup %3207 }
 0x112   :  { %v3210_v25 = vpop.eup %3209  ;;  %v323_v26 = vmul.f32 %v3208_v20, %v293_v12 }
 0x113   :  { %v3212_v29 = vpop.eup %3211  ;;  %v318_v33 = vadd.f32 1.0, %v3210_v25 }
 0x114   :  { %v325_v31 = vadd.f32 %v323_v26, %v37_v18  ;;  %v324_v32 = vmul.f32 %v3212_v29, %v294_v28  ;;  %v354_v29 = vunpack.c.h.bf16 %v2597_v56 }
 0x116   :  { %3213 = vtanh.f32 %v325_v31  ;;  %v326_v34 = vadd.f32 %v324_v32, %v40_v27  ;;  %v351_v27 = vunpack.c.h.bf16 %v2595_v55 }
 0x117   :  { %3215 = vrcp.f32 %v317_v30 }
 0x118   :  { %3217 = vtanh.f32 %v326_v34 }
 0x119   :  { %3219 = vrcp.f32 %v318_v33 }
 0x120   :  { %v3214_v35 = vpop.eup %3213 }
 0x121   :  { %v3216_v36 = vpop.eup %3215  ;;  %v329_v37 = vsub.f32 %v3513_v23, %v3214_v35 }
 0x122   :  { %v3218_v38 = vpop.eup %3217 }
 0x123   :  { %v330_v39 = vsub.f32 %v3518_v24, %v3218_v38  ;;  %v331_v40 = vmul.f32 %v3216_v36, %v329_v37  ;;  %v3220_v41 = vpop.eup %3219 }
 0x125   :  { %v332_v42 = vmul.f32 %v3220_v41, %v330_v39  ;;  %v333_v43 = vadd.f32 %v3214_v35, %v331_v40 }
 0x127   :  { %v334_v46 = vadd.f32 %v3218_v38, %v332_v42  ;;  %335 = vst [vmem:[%s4221_s5] sm:$0xff] %v333_v43  ;;  %v3620_v23 = vadd.f32 %v337_v44, %v333_v43  ;;  %v2596_v38 = vld [vmem:[%s4218_s0 + $0x20] ss:$12 sps:$4 sm:$0xff]  }
 0x128   :  { %v352_v40 = vunpack.c.l.bf16 %v2596_v38 }
 0x129   :  { %336 = vst [vmem:[%s4221_s5 + $0x8] sm:$0xff] %v334_v46  ;;  %v3622_v24 = vadd.f32 %v338_v45, %v334_v46  ;;  %v355_v45 = vunpack.c.h.bf16 %v2596_v38 }
 0x12b   :  { %v356_v47 = vpack.c.bf16 %v3622_v24, %v3620_v23 }
 0x12d   :  { %550 = vmatmul.mubr.bf16.vlgmr.msra.gmra.mrb[4].mxu0 %v356_v47  ;;  %2963 = vmatmul.mubr.bf16.vlgmr.msra.gmra.mrb[4].mxu1 %v356_v47 }
 0x12e   :  { %835 = vmatpush1.bf16.msra.mxu0 %v3404_v3  ;;  %866 = vmatprep.mubr.bf16.mxu0 %v3362_v2 }
 0x12f   :  { %836 = vmatprep.subr.bf16.mxu0 %v3412_v4  ;;  %2982 = vmatprep.mubr.msk.bf16.mxu1 %vm3363_vm0, %v3361_v1 }
 0x130   :  { %2967 = vmatpush3.bf16.msra.mxu1 %v3129_v48 }
 0x131   :  { %2968 = vmatprep.subr.bf16.mxu1 %v3361_v1 }
 0x132   :  { %837 = vmatpush1.bf16.msra.mxu0 %v3418_v5 }
 0x133   :  { %838 = vmatprep.subr.bf16.mxu0 %v3424_v6 }
 0x134   :  { %2969 = vmatpush3.bf16.msra.mxu1 %v3130_v49 }
 0x135   :  { %2970 = vmatprep.subr.bf16.mxu1 %v3361_v1 }
 0x136   :  { %839 = vmatpush1.bf16.msra.mxu0 %v3430_v7 }
 0x137   :  { %840 = vmatprep.subr.bf16.mxu0 %v3436_v8 }
 0x138   :  { %2971 = vmatpush3.bf16.msra.mxu1 %v3131_v50 }
 0x139   :  { %2972 = vmatprep.subr.bf16.mxu1 %v3361_v1 }
 0x13a   :  { %841 = vmatpush1.bf16.msra.mxu0 %v3445_v10 }
 0x13b   :  { %842 = vmatprep.subr.bf16.mxu0 %v3451_v11 }
 0x13e   :  { %843 = vmatpush1.bf16.msra.mxu0 %v3460_v13 }
 0x13f   :  { %844 = vmatprep.subr.bf16.mxu0 %v3470_v15 }
 0x142   :  { %845 = vmatpush1.bf16.msra.mxu0 %v3476_v16 }
 0x143   :  { %846 = vmatprep.subr.bf16.mxu0 %v3482_v17 }
 0x146   :  { %847 = vmatpush1.bf16.msra.mxu0 %v3492_v19 }
 0x147   :  { %848 = vmatprep.subr.bf16.mxu0 %v3500_v21 }
 0x14a   :  { %849 = vmatpush1.bf16.msra.mxu0 %v3508_v22 }
 0x14b   :  { %1151 = vmatprep.subr.bf16.mxu0 %v3397_v0  ;;  %v3132_v0 = vld [vmem:[%s4216_s3 + $0x50] ss:$12 sps:$4 sm:$0xff]  }
 0x14c   :  { %2973 = vmatpush3.bf16.msra.mxu1 %v3132_v0 }
 0x14d   :  { %2974 = vmatprep.subr.bf16.mxu1 %v3361_v1 }
 0x150   :  { %2975 = vmatpush3.bf16.msra.mxu1 %v3133_v51 }
 0x151   :  { %2976 = vmatprep.subr.bf16.mxu1 %v3361_v1 }
 0x154   :  { %2977 = vmatpush3.bf16.msra.mxu1 %v3134_v52 }
 0x155   :  { %2978 = vmatprep.subr.bf16.mxu1 %v3361_v1 }
 0x158   :  { %2979 = vmatpush3.bf16.msra.mxu1 %v3135_v53 }
 0x159   :  { %2980 = vmatprep.subr.bf16.mxu1 %v3361_v1 }
 0x15c   :  { %2981 = vmatpush3.bf16.msra.mxu1 %v3136_v54 }
 0x15d   :  { %2986 = vmatprep.subr.bf16.mxu1 %v3361_v1 }
 0x200   :  { %v551_v59 = vpop.f32.mrb[4].mxu0  ;;  %v594_v60 = vpop.f32.mrb[4].mxu1 }
 0x201   :  { %v610_v61 = vadd.f32 %v551_v59, %v350_v57  ;;  %v553_v62 = vpop.f32.mrb[5].mxu0  ;;  %v2964_v9 = vpop.f32.mrb[5].mxu1  ;;  %v608_v41 = vadd.f32 %v3599_v63, %v594_v60 }
 0x202   :  { %v555_v12 = vpop.f32.mrb[6].mxu0  ;;  %v597_v14 = vpop.f32.mrb[6].mxu1  ;;  %v624_v30 = vadd.f32 %v553_v62, %v351_v27  ;;  %v2631_v62 = vld [vmem:[%s4220_s1 + $0x18] sm:$0xff] }
 0x203   :  { %v2624_v18 = vmul.f32 -1.442695, %v610_v61  ;;  %v611_v20 = vadd.f32 %v555_v12, %v353_v58  ;;  %v557_v25 = vpop.f32.mrb[7].mxu0  ;;  %v2965_v26 = vpop.f32.mrb[7].mxu1  ;;  %v609_v46 = vadd.f32 %v3599_v63, %v597_v14  ;;  %v2630_v61 = vld [vmem:[%s4220_s1 + $0x10] sm:$0xff] }
 0x204   :  { %v625_v31 = vadd.f32 %v557_v25, %v354_v29  ;;  %v2626_v32 = vmul.f32 -1.442695, %v624_v30 }
 0x205   :  { %3221 = vpow2.f32 %v2624_v18  ;;  %v2625_v28 = vmul.f32 -1.442695, %v611_v20 }
 0x206   :  { %v2627_v34 = vmul.f32 -1.442695, %v625_v31 }
 0x207   :  { %3223 = vpow2.f32 %v2625_v28 }
 0x208   :  { %3225 = vpow2.f32 %v2626_v32 }
 0x20f   :  { %v3222_v33 = vpop.eup %3221 }
 0x210   :  { %v618_v35 = vadd.f32 1.0, %v3222_v33 }
 0x211   :  { %v3224_v36 = vpop.eup %3223 }
 0x212   :  { %3227 = vrcp.f32 %v618_v35  ;;  %v619_v37 = vadd.f32 1.0, %v3224_v36  ;;  %v3226_v39 = vpop.eup %3225 }
 0x213   :  { %3229 = vpow2.f32 %v2627_v34  ;;  %v632_v48 = vadd.f32 1.0, %v3226_v39 }
 0x214   :  { %3231 = vrcp.f32 %v619_v37 }
 0x21c   :  { %v3228_v42 = vpop.eup %3227 }
 0x21d   :  { %v3230_v43 = vpop.eup %3229  ;;  %v638_v44 = vmul.f32 %v3228_v42, %v608_v41  ;;  %v2633_v41 = vld [vmem:[%s4218_s0 + $0x38] ss:$12 sps:$4 sm:$0xff]  }
 0x21e   :  { %v3232_v47 = vpop.eup %3231  ;;  %v633_v51 = vadd.f32 1.0, %v3230_v43  ;;  %v669_v43 = vunpack.c.l.bf16 %v2633_v41 }
 0x21f   :  { %v640_v49 = vadd.f32 %v638_v44, %v352_v40  ;;  %v639_v50 = vmul.f32 %v3232_v47, %v609_v46 }
 0x221   :  { %3233 = vtanh.f32 %v640_v49  ;;  %v641_v0 = vadd.f32 %v639_v50, %v355_v45 }
 0x222   :  { %3235 = vrcp.f32 %v632_v48  ;;  %v672_v48 = vunpack.c.h.bf16 %v2633_v41 }
 0x223   :  { %3237 = vtanh.f32 %v641_v0 }
 0x224   :  { %3239 = vrcp.f32 %v633_v51 }
 0x22b   :  { %v3234_v52 = vpop.eup %3233 }
 0x22c   :  { %v3236_v53 = vpop.eup %3235  ;;  %v644_v54 = vsub.f32 %v3620_v23, %v3234_v52 }
 0x22d   :  { %v3238_v55 = vpop.eup %3237 }
 0x22e   :  { %v645_v56 = vsub.f32 %v3622_v24, %v3238_v55  ;;  %v646_v57 = vmul.f32 %v3236_v53, %v644_v54  ;;  %v3240_v58 = vpop.eup %3239 }
 0x230   :  { %v647_v59 = vmul.f32 %v3240_v58, %v645_v56  ;;  %v648_v60 = vadd.f32 %v3234_v52, %v646_v57 }
 0x232   :  { %v649_v9 = vadd.f32 %v3238_v55, %v647_v59  ;;  %2628 = vst [vmem:[%s4221_s5 + $0x10] sm:$0xff] %v648_v60  ;;  %v3702_v23 = vadd.f32 %v2630_v61, %v648_v60 }
 0x234   :  { %2629 = vst [vmem:[%s4221_s5 + $0x18] sm:$0xff] %v649_v9  ;;  %v3704_v24 = vadd.f32 %v2631_v62, %v649_v9 }
 0x236   :  { %v673_v12 = vpack.c.bf16 %v3704_v24, %v3702_v23 }
 0x238   :  { %867 = vmatmul.mubr.bf16.vlgmr.msra.gmra.mrb[8].mxu0 %v673_v12  ;;  %2983 = vmatmul.mubr.bf16.vlgmr.msra.gmra.mrb[8].mxu1 %v673_v12  ;;  %v2667_v12 = vld [vmem:[%s4220_s1 + $0x20] sm:$0xff] }
 0x239   :  { %1152 = vmatpush1.bf16.msra.mxu0 %v3404_v3  ;;  %1183 = vmatprep.mubr.bf16.mxu0 %v3362_v2  ;;  %v3137_v3 = vld [vmem:[%s4216_s3 + $0x8] ss:$12 sps:$4 sm:$0xff]  }
 0x23a   :  { %1153 = vmatprep.subr.bf16.mxu0 %v3412_v4  ;;  %3002 = vmatprep.mubr.msk.bf16.mxu1 %vm3363_vm0, %v3361_v1  ;;  %v3138_v4 = vld [vmem:[%s4216_s3 + $0x20] ss:$12 sps:$4 sm:$0xff]  }
 0x23b   :  { %2987 = vmatpush3.bf16.msra.mxu1 %v3137_v3  ;;  %v2668_v3 = vld [vmem:[%s4220_s1 + $0x28] sm:$0xff] }
 0x23c   :  { %2988 = vmatprep.subr.bf16.mxu1 %v3361_v1 }
 0x23d   :  { %1154 = vmatpush1.bf16.msra.mxu0 %v3418_v5  ;;  %v3139_v5 = vld [vmem:[%s4216_s3 + $0x38] ss:$12 sps:$4 sm:$0xff]  }
 0x23e   :  { %1155 = vmatprep.subr.bf16.mxu0 %v3424_v6  ;;  %v3140_v6 = vld [vmem:[%s4216_s3 + $0x50] ss:$12 sps:$4 sm:$0xff]  }
 0x23f   :  { %2989 = vmatpush3.bf16.msra.mxu1 %v3138_v4 }
 0x240   :  { %2990 = vmatprep.subr.bf16.mxu1 %v3361_v1 }
 0x241   :  { %1156 = vmatpush1.bf16.msra.mxu0 %v3430_v7  ;;  %v3141_v7 = vld [vmem:[%s4216_s3 + $0x68] ss:$12 sps:$4 sm:$0xff]  }
 0x242   :  { %1157 = vmatprep.subr.bf16.mxu0 %v3436_v8  ;;  %v3142_v8 = vld [vmem:[%s4216_s3 + $0x80] ss:$12 sps:$4 sm:$0xff]  }
 0x243   :  { %2991 = vmatpush3.bf16.msra.mxu1 %v3139_v5 }
 0x244   :  { %2992 = vmatprep.subr.bf16.mxu1 %v3361_v1 }
 0x245   :  { %1158 = vmatpush1.bf16.msra.mxu0 %v3445_v10  ;;  %v3143_v10 = vld [vmem:[%s4216_s3 + $0x98] ss:$12 sps:$4 sm:$0xff]  }
 0x246   :  { %1159 = vmatprep.subr.bf16.mxu0 %v3451_v11  ;;  %v3144_v11 = vld [vmem:[%s4216_s3 + $0xb0] ss:$12 sps:$4 sm:$0xff]  }
 0x247   :  { %2993 = vmatpush3.bf16.msra.mxu1 %v3140_v6  ;;  %v3795_v6 = vld [vmem:[%s4216_s3 + $0x4] ss:$12 sps:$4 sm:$0xff]  }
 0x248   :  { %2994 = vmatprep.subr.bf16.mxu1 %v3361_v1 }
 0x249   :  { %1160 = vmatpush1.bf16.msra.mxu0 %v3460_v13  ;;  %v2632_v13 = vld [vmem:[%s4218_s0 + $0x30] sm:$0xff] }
 0x24a   :  { %1161 = vmatprep.subr.bf16.mxu0 %v3470_v15  ;;  %v2634_v15 = vld [vmem:[%s4218_s0 + $0x3c] sm:$0xff]  ;;  %v668_v30 = vunpack.c.h.bf16 %v2632_v13 }
 0x24b   :  { %2995 = vmatpush3.bf16.msra.mxu1 %v3141_v7  ;;  %v671_v32 = vunpack.c.h.bf16 %v2634_v15  ;;  %v3800_v7 = vld [vmem:[%s4216_s3] ss:$12 sps:$4 sm:$0xff]  }
 0x24c   :  { %2996 = vmatprep.subr.bf16.mxu1 %v3361_v1 }
 0x24d   :  { %1162 = vmatpush1.bf16.msra.mxu0 %v3476_v16  ;;  %v667_v16 = vunpack.c.l.bf16 %v2632_v13  ;;  %v3152_v13 = vld [vmem:[%s4216_s3 + $0x20] ss:$12 sps:$4 sm:$0xff]  }
 0x24e   :  { %1163 = vmatprep.subr.bf16.mxu0 %v3482_v17  ;;  %v670_v17 = vunpack.c.l.bf16 %v2634_v15  ;;  %v3826_v15 = vld [vmem:[%s4216_s3 + $0x34] ss:$12 sps:$4 sm:$0xff]  }
 0x24f   :  { %2997 = vmatpush3.bf16.msra.mxu1 %v3142_v8  ;;  %v3148_v8 = vld [vmem:[%s4216_s3 + $0x8] ss:$12 sps:$4 sm:$0xff]  }
 0x250   :  { %2998 = vmatprep.subr.bf16.mxu1 %v3361_v1 }
 0x251   :  { %1164 = vmatpush1.bf16.msra.mxu0 %v3492_v19 }
 0x252   :  { %1165 = vmatprep.subr.bf16.mxu0 %v3500_v21 }
 0x253   :  { %2999 = vmatpush3.bf16.msra.mxu1 %v3143_v10  ;;  %v3810_v10 = vld [vmem:[%s4216_s3 + $0x1c] ss:$12 sps:$4 sm:$0xff]  }
 0x254   :  { %3000 = vmatprep.subr.bf16.mxu1 %v3361_v1 }
 0x255   :  { %1166 = vmatpush1.bf16.msra.mxu0 %v3508_v22 }
 0x256   :  { %1468 = vmatprep.subr.bf16.mxu0 %v3795_v6 }
 0x257   :  { %3001 = vmatpush3.bf16.msra.mxu1 %v3144_v11  ;;  %v3816_v11 = vld [vmem:[%s4216_s3 + $0x18] ss:$12 sps:$4 sm:$0xff]  }
 0x258   :  { %3006 = vmatprep.subr.bf16.mxu1 %v3361_v1 }
 0x30b   :  { %v868_v19 = vpop.f32.mrb[8].mxu0  ;;  %v911_v21 = vpop.f32.mrb[8].mxu1 }
 0x30c   :  { %v927_v22 = vadd.f32 %v868_v19, %v667_v16  ;;  %v870_v14 = vpop.f32.mrb[9].mxu0  ;;  %v2984_v18 = vpop.f32.mrb[9].mxu1  ;;  %v925_v44 = vadd.f32 %v3599_v63, %v911_v21  ;;  %v3832_v16 = vld [vmem:[%s4216_s3 + $0x30] ss:$12 sps:$4 sm:$0xff]   ;;  %v3842_v19 = vld [vmem:[%s4216_s3 + $0x4c] ss:$12 sps:$4 sm:$0xff]  }
 0x30d   :  { %v872_v20 = vpop.f32.mrb[10].mxu0  ;;  %v914_v25 = vpop.f32.mrb[10].mxu1  ;;  %v941_v33 = vadd.f32 %v870_v14, %v668_v30  ;;  %v3848_v21 = vld [vmem:[%s4216_s3 + $0x48] ss:$12 sps:$4 sm:$0xff]   ;;  %v3857_v14 = vld [vmem:[%s4216_s3 + $0x64] ss:$12 sps:$4 sm:$0xff]  }
 0x30e   :  { %v2661_v26 = vmul.f32 -1.442695, %v927_v22  ;;  %v928_v27 = vadd.f32 %v872_v20, %v670_v17  ;;  %v874_v28 = vpop.f32.mrb[11].mxu0  ;;  %v2985_v29 = vpop.f32.mrb[11].mxu1  ;;  %v926_v49 = vadd.f32 %v3599_v63, %v914_v25  ;;  %v3156_v17 = vld [vmem:[%s4216_s3 + $0x38] ss:$12 sps:$4 sm:$0xff]  }
 0x30f   :  { %v942_v34 = vadd.f32 %v874_v28, %v671_v32  ;;  %v2663_v35 = vmul.f32 -1.442695, %v941_v33  ;;  %v3160_v22 = vld [vmem:[%s4216_s3 + $0x50] ss:$12 sps:$4 sm:$0xff]   ;;  %v3863_v18 = vld [vmem:[%s4216_s3 + $0x60] ss:$12 sps:$4 sm:$0xff]  }
 0x310   :  { %3241 = vpow2.f32 %v2661_v26  ;;  %v2662_v31 = vmul.f32 -1.442695, %v928_v27  ;;  %v3164_v20 = vld [vmem:[%s4216_s3 + $0x68] ss:$12 sps:$4 sm:$0xff]   ;;  %v3879_v26 = vld [vmem:[%s4216_s3 + $0x78] ss:$12 sps:$4 sm:$0xff]  }
 0x311   :  { %v2664_v37 = vmul.f32 -1.442695, %v942_v34  ;;  %v3873_v25 = vld [vmem:[%s4216_s3 + $0x7c] ss:$12 sps:$4 sm:$0xff]   ;;  %v3168_v27 = vld [vmem:[%s4216_s3 + $0x80] ss:$12 sps:$4 sm:$0xff]  }
 0x312   :  { %3243 = vpow2.f32 %v2662_v31  ;;  %v3889_v28 = vld [vmem:[%s4216_s3 + $0x94] ss:$12 sps:$4 sm:$0xff]   ;;  %v3895_v29 = vld [vmem:[%s4216_s3 + $0x90] ss:$12 sps:$4 sm:$0xff]   ;;  %v3172_v30 = vld [vmem:[%s4216_s3 + $0x98] ss:$12 sps:$4 sm:$0xff]  }
 0x313   :  { %3245 = vpow2.f32 %v2663_v35  ;;  %v3905_v31 = vld [vmem:[%s4216_s3 + $0xac] ss:$12 sps:$4 sm:$0xff]   ;;  %v3911_v32 = vld [vmem:[%s4216_s3 + $0xa8] ss:$12 sps:$4 sm:$0xff]   ;;  %v3176_v33 = vld [vmem:[%s4216_s3 + $0xb0] ss:$12 sps:$4 sm:$0xff]  }
 0x314   :  { %v2669_v34 = vld [vmem:[%s4218_s0 + $0x48] sm:$0xff]  ;;  %v2671_v35 = vld [vmem:[%s4218_s0 + $0x54] sm:$0xff] }
 0x31a   :  { %v3242_v36 = vpop.eup %3241 }
 0x31b   :  { %v935_v38 = vadd.f32 1.0, %v3242_v36  ;;  %v984_v36 = vunpack.c.l.bf16 %v2669_v34 }
 0x31c   :  { %v3244_v39 = vpop.eup %3243 }
 0x31d   :  { %3247 = vrcp.f32 %v935_v38  ;;  %v936_v40 = vadd.f32 1.0, %v3244_v39  ;;  %v3246_v42 = vpop.eup %3245 }
 0x31e   :  { %3249 = vpow2.f32 %v2664_v37  ;;  %v949_v0 = vadd.f32 1.0, %v3246_v42  ;;  %v987_v37 = vunpack.c.l.bf16 %v2671_v35 }
 0x31f   :  { %3251 = vrcp.f32 %v936_v40 }
 0x327   :  { %v3248_v45 = vpop.eup %3247 }
 0x328   :  { %v3250_v46 = vpop.eup %3249  ;;  %v955_v47 = vmul.f32 %v3248_v45, %v925_v44 }
 0x329   :  { %v3252_v50 = vpop.eup %3251  ;;  %v950_v54 = vadd.f32 1.0, %v3250_v46 }
 0x32a   :  { %v957_v51 = vadd.f32 %v955_v47, %v669_v43  ;;  %v956_v52 = vmul.f32 %v3252_v50, %v926_v49  ;;  %v985_v49 = vunpack.c.h.bf16 %v2669_v34 }
 0x32c   :  { %3253 = vtanh.f32 %v957_v51  ;;  %v958_v53 = vadd.f32 %v956_v52, %v672_v48 }
 0x32d   :  { %3255 = vrcp.f32 %v949_v0  ;;  %v988_v0 = vunpack.c.h.bf16 %v2671_v35 }
 0x32e   :  { %3257 = vtanh.f32 %v958_v53 }
 0x32f   :  { %3259 = vrcp.f32 %v950_v54 }
 0x336   :  { %v3254_v55 = vpop.eup %3253 }
 0x337   :  { %v3256_v56 = vpop.eup %3255  ;;  %v961_v57 = vsub.f32 %v3702_v23, %v3254_v55 }
 0x338   :  { %v3258_v58 = vpop.eup %3257 }
 0x339   :  { %v962_v59 = vsub.f32 %v3704_v24, %v3258_v58  ;;  %v963_v60 = vmul.f32 %v3256_v56, %v961_v57  ;;  %v3260_v61 = vpop.eup %3259 }
 0x33b   :  { %v964_v62 = vmul.f32 %v3260_v61, %v962_v59  ;;  %v965_v9 = vadd.f32 %v3254_v55, %v963_v60  ;;  %v2670_v59 = vld [vmem:[%s4218_s0 + $0x50] ss:$12 sps:$4 sm:$0xff]  }
 0x33c   :  { %v986_v61 = vunpack.c.l.bf16 %v2670_v59 }
 0x33d   :  { %v966_v4 = vadd.f32 %v3258_v58, %v964_v62  ;;  %2665 = vst [vmem:[%s4221_s5 + $0x20] sm:$0xff] %v965_v9  ;;  %v3783_v23 = vadd.f32 %v2667_v12, %v965_v9 }
 0x33f   :  { %2666 = vst [vmem:[%s4221_s5 + $0x28] sm:$0xff] %v966_v4  ;;  %v3785_v24 = vadd.f32 %v2668_v3, %v966_v4  ;;  %v989_v4 = vunpack.c.h.bf16 %v2670_v59 }
 0x341   :  { %v990_v5 = vpack.c.bf16 %v3785_v24, %v3783_v23 }
 0x343   :  { %1184 = vmatmul.mubr.bf16.vlgmr.msra.gmra.mrb[12].mxu0 %v990_v5  ;;  %3003 = vmatmul.mubr.bf16.vlgmr.msra.gmra.mrb[12].mxu1 %v990_v5 }
 0x344   :  { %1500 = vmatprep.mubr.bf16.mxu0 %v3362_v2  ;;  %3022 = vmatprep.mubr.msk.bf16.mxu1 %vm3363_vm0, %v3361_v1 }
 0x345   :  { %1469 = vmatpush1.bf16.msra.mxu0 %v3800_v7  ;;  %3007 = vmatpush3.bf16.msra.mxu1 %v3148_v8 }
 0x346   :  { %3008 = vmatprep.subr.bf16.mxu1 %v3361_v1  ;;  %1470 = vmatprep.subr.bf16.mxu0 %v3810_v10 }
 0x349   :  { %1471 = vmatpush1.bf16.msra.mxu0 %v3816_v11  ;;  %3009 = vmatpush3.bf16.msra.mxu1 %v3152_v13 }
 0x34a   :  { %3010 = vmatprep.subr.bf16.mxu1 %v3361_v1  ;;  %1472 = vmatprep.subr.bf16.mxu0 %v3826_v15 }
 0x34d   :  { %1473 = vmatpush1.bf16.msra.mxu0 %v3832_v16  ;;  %3011 = vmatpush3.bf16.msra.mxu1 %v3156_v17 }
 0x34e   :  { %3012 = vmatprep.subr.bf16.mxu1 %v3361_v1  ;;  %1474 = vmatprep.subr.bf16.mxu0 %v3842_v19 }
 0x351   :  { %1475 = vmatpush1.bf16.msra.mxu0 %v3848_v21  ;;  %3013 = vmatpush3.bf16.msra.mxu1 %v3160_v22 }
 0x352   :  { %1476 = vmatprep.subr.bf16.mxu0 %v3857_v14  ;;  %3014 = vmatprep.subr.bf16.mxu1 %v3361_v1 }
 0x355   :  { %1477 = vmatpush1.bf16.msra.mxu0 %v3863_v18  ;;  %3015 = vmatpush3.bf16.msra.mxu1 %v3164_v20 }
 0x356   :  { %1478 = vmatprep.subr.bf16.mxu0 %v3873_v25  ;;  %3016 = vmatprep.subr.bf16.mxu1 %v3361_v1 }
 0x359   :  { %1479 = vmatpush1.bf16.msra.mxu0 %v3879_v26  ;;  %3017 = vmatpush3.bf16.msra.mxu1 %v3168_v27 }
 0x35a   :  { %1480 = vmatprep.subr.bf16.mxu0 %v3889_v28  ;;  %3018 = vmatprep.subr.bf16.mxu1 %v3361_v1 }
 0x35d   :  { %1481 = vmatpush1.bf16.msra.mxu0 %v3895_v29  ;;  %3019 = vmatpush3.bf16.msra.mxu1 %v3172_v30 }
 0x35e   :  { %1482 = vmatprep.subr.bf16.mxu0 %v3905_v31  ;;  %3020 = vmatprep.subr.bf16.mxu1 %v3361_v1 }
 0x361   :  { %1483 = vmatpush1.bf16.msra.mxu0 %v3911_v32  ;;  %3021 = vmatpush3.bf16.msra.mxu1 %v3176_v33 }
 0x362   :  { %1785 = vmatprep.subr.bf16.mxu0 %v3795_v6  ;;  %3026 = vmatprep.subr.bf16.mxu1 %v3361_v1 }
 0x416   :  { %v1185_v38 = vpop.f32.mrb[12].mxu0  ;;  %v1228_v39 = vpop.f32.mrb[12].mxu1 }
 0x417   :  { %v1244_v40 = vadd.f32 %v1185_v38, %v984_v36  ;;  %v1187_v41 = vpop.f32.mrb[13].mxu0  ;;  %v3004_v42 = vpop.f32.mrb[13].mxu1  ;;  %v1242_v62 = vadd.f32 %v3599_v63, %v1228_v39 }
 0x418   :  { %v1189_v43 = vpop.f32.mrb[14].mxu0  ;;  %v1231_v44 = vpop.f32.mrb[14].mxu1  ;;  %v1258_v51 = vadd.f32 %v1187_v41, %v985_v49  ;;  %v2705_v41 = vld [vmem:[%s4220_s1 + $0x38] sm:$0xff]  ;;  %v3182_v49 = vld [vmem:[%s4216_s3 + $0x80] ss:$12 sps:$4 sm:$0xff]  }
 0x419   :  { %v2698_v45 = vmul.f32 -1.442695, %v1244_v40  ;;  %v1245_v46 = vadd.f32 %v1189_v43, %v987_v37  ;;  %v1191_v47 = vpop.f32.mrb[15].mxu0  ;;  %v3005_v48 = vpop.f32.mrb[15].mxu1  ;;  %v1243_v5 = vadd.f32 %v3599_v63, %v1231_v44  ;;  %v2704_v40 = vld [vmem:[%s4220_s1 + $0x30] sm:$0xff] }
 0x41a   :  { %v1259_v52 = vadd.f32 %v1191_v47, %v988_v0  ;;  %v2700_v53 = vmul.f32 -1.442695, %v1258_v51  ;;  %v3177_v44 = vld [vmem:[%s4216_s3 + $0x8] ss:$12 sps:$4 sm:$0xff]   ;;  %v3180_v47 = vld [vmem:[%s4216_s3 + $0x50] ss:$12 sps:$4 sm:$0xff]  }
 0x41b   :  { %3261 = vpow2.f32 %v2698_v45  ;;  %v2699_v50 = vmul.f32 -1.442695, %v1245_v46  ;;  %v3178_v45 = vld [vmem:[%s4216_s3 + $0x20] ss:$12 sps:$4 sm:$0xff]   ;;  %v3179_v46 = vld [vmem:[%s4216_s3 + $0x38] ss:$12 sps:$4 sm:$0xff]  }
 0x41c   :  { %v2701_v55 = vmul.f32 -1.442695, %v1259_v52  ;;  %v3181_v48 = vld [vmem:[%s4216_s3 + $0x68] ss:$12 sps:$4 sm:$0xff]   ;;  %v3184_v0 = vld [vmem:[%s4216_s3 + $0xb0] ss:$12 sps:$4 sm:$0xff]  }
 0x41d   :  { %3263 = vpow2.f32 %v2699_v50  ;;  %v3183_v50 = vld [vmem:[%s4216_s3 + $0x98] ss:$12 sps:$4 sm:$0xff]   ;;  %v2708_v52 = vld [vmem:[%s4218_s0 + $0x6c] sm:$0xff] }
 0x41e   :  { %3265 = vpow2.f32 %v2700_v53  ;;  %v2706_v51 = vld [vmem:[%s4218_s0 + $0x60] sm:$0xff] }
 0x41f   :  { %v1301_v53 = vunpack.c.l.bf16 %v2706_v51 }
 0x425   :  { %v3262_v54 = vpop.eup %3261 }
 0x426   :  { %v1252_v56 = vadd.f32 1.0, %v3262_v54  ;;  %v1304_v54 = vunpack.c.l.bf16 %v2708_v52 }
 0x427   :  { %v3264_v57 = vpop.eup %3263 }
 0x428   :  { %3267 = vrcp.f32 %v1252_v56  ;;  %v1253_v58 = vadd.f32 1.0, %v3264_v57  ;;  %v3266_v60 = vpop.eup %3265 }
 0x429   :  { %3269 = vpow2.f32 %v2701_v55  ;;  %v1266_v13 = vadd.f32 1.0, %v3266_v60 }
 0x42a   :  { %3271 = vrcp.f32 %v1253_v58 }
 0x432   :  { %v3268_v9 = vpop.eup %3267 }
 0x433   :  { %v3270_v12 = vpop.eup %3269  ;;  %v1272_v3 = vmul.f32 %v3268_v9, %v1242_v62 }
 0x434   :  { %v3272_v8 = vpop.eup %3271  ;;  %v1267_v27 = vadd.f32 1.0, %v3270_v12 }
 0x435   :  { %v1274_v17 = vadd.f32 %v1272_v3, %v986_v61  ;;  %v1273_v22 = vmul.f32 %v3272_v8, %v1243_v5  ;;  %v1305_v8 = vunpack.c.h.bf16 %v2708_v52 }
 0x437   :  { %3273 = vtanh.f32 %v1274_v17  ;;  %v1275_v20 = vadd.f32 %v1273_v22, %v989_v4  ;;  %v1302_v4 = vunpack.c.h.bf16 %v2706_v51 }
 0x438   :  { %3275 = vrcp.f32 %v1266_v13 }
 0x439   :  { %3277 = vtanh.f32 %v1275_v20 }
 0x43a   :  { %3279 = vrcp.f32 %v1267_v27 }
 0x441   :  { %v3274_v30 = vpop.eup %3273 }
 0x442   :  { %v3276_v33 = vpop.eup %3275  ;;  %v1278_v34 = vsub.f32 %v3783_v23, %v3274_v30 }
 0x443   :  { %v3278_v35 = vpop.eup %3277 }
 0x444   :  { %v1279_v36 = vsub.f32 %v3785_v24, %v3278_v35  ;;  %v1280_v37 = vmul.f32 %v3276_v33, %v1278_v34  ;;  %v3280_v38 = vpop.eup %3279 }
 0x446   :  { %v1281_v63 = vmul.f32 %v3280_v38, %v1279_v36  ;;  %v1282_v39 = vadd.f32 %v3274_v30, %v1280_v37  ;;  %v4015_v36 = vld [vmem:[%s4219_s4] ss:$0 sm:$0xff] }
 0x448   :  { %v1283_v42 = vadd.f32 %v3278_v35, %v1281_v63  ;;  %2702 = vst [vmem:[%s4221_s5 + $0x30] sm:$0xff] %v1282_v39  ;;  %v3946_v23 = vadd.f32 %v2704_v40, %v1282_v39  ;;  %v2707_v35 = vld [vmem:[%s4218_s0 + $0x68] ss:$12 sps:$4 sm:$0xff]  }
 0x449   :  { %v1303_v38 = vunpack.c.l.bf16 %v2707_v35 }
 0x44a   :  { %2703 = vst [vmem:[%s4221_s5 + $0x38] sm:$0xff] %v1283_v42  ;;  %v3948_v24 = vadd.f32 %v2705_v41, %v1283_v42  ;;  %v1306_v42 = vunpack.c.h.bf16 %v2707_v35 }
 0x44c   :  { %v1307_v43 = vpack.c.bf16 %v3948_v24, %v3946_v23 }
 0x44e   :  { %1501 = vmatmul.mubr.bf16.vlgmr.msra.gmra.mrb[16].mxu0 %v1307_v43  ;;  %3023 = vmatmul.mubr.bf16.vlgmr.msra.gmra.mrb[16].mxu1 %v1307_v43 }
 0x44f   :  { %1786 = vmatpush1.bf16.msra.mxu0 %v3800_v7  ;;  %1817 = vmatprep.mubr.bf16.mxu0 %v3362_v2 }
 0x450   :  { %1787 = vmatprep.subr.bf16.mxu0 %v3810_v10  ;;  %3042 = vmatprep.mubr.msk.bf16.mxu1 %vm3363_vm0, %v3361_v1 }
 0x451   :  { %3027 = vmatpush3.bf16.msra.mxu1 %v3177_v44 }
 0x452   :  { %3028 = vmatprep.subr.bf16.mxu1 %v3361_v1 }
 0x453   :  { %1788 = vmatpush1.bf16.msra.mxu0 %v3816_v11 }
 0x454   :  { %1789 = vmatprep.subr.bf16.mxu0 %v3826_v15 }
 0x455   :  { %3029 = vmatpush3.bf16.msra.mxu1 %v3178_v45 }
 0x456   :  { %3030 = vmatprep.subr.bf16.mxu1 %v3361_v1 }
 0x457   :  { %1790 = vmatpush1.bf16.msra.mxu0 %v3832_v16 }
 0x458   :  { %1791 = vmatprep.subr.bf16.mxu0 %v3842_v19 }
 0x459   :  { %3031 = vmatpush3.bf16.msra.mxu1 %v3179_v46 }
 0x45a   :  { %3032 = vmatprep.subr.bf16.mxu1 %v3361_v1 }
 0x45b   :  { %1792 = vmatpush1.bf16.msra.mxu0 %v3848_v21 }
 0x45c   :  { %1793 = vmatprep.subr.bf16.mxu0 %v3857_v14 }
 0x45d   :  { %3033 = vmatpush3.bf16.msra.mxu1 %v3180_v47 }
 0x45e   :  { %3034 = vmatprep.subr.bf16.mxu1 %v3361_v1 }
 0x45f   :  { %1794 = vmatpush1.bf16.msra.mxu0 %v3863_v18 }
 0x460   :  { %1795 = vmatprep.subr.bf16.mxu0 %v3873_v25 }
 0x461   :  { %3035 = vmatpush3.bf16.msra.mxu1 %v3181_v48 }
 0x462   :  { %3036 = vmatprep.subr.bf16.mxu1 %v3361_v1 }
 0x463   :  { %1796 = vmatpush1.bf16.msra.mxu0 %v3879_v26 }
 0x464   :  { %1797 = vmatprep.subr.bf16.mxu0 %v3889_v28 }
 0x465   :  { %3037 = vmatpush3.bf16.msra.mxu1 %v3182_v49 }
 0x466   :  { %3038 = vmatprep.subr.bf16.mxu1 %v3361_v1 }
 0x467   :  { %1798 = vmatpush1.bf16.msra.mxu0 %v3895_v29 }
 0x468   :  { %1799 = vmatprep.subr.bf16.mxu0 %v3905_v31 }
 0x469   :  { %3039 = vmatpush3.bf16.msra.mxu1 %v3183_v50 }
 0x46a   :  { %3040 = vmatprep.subr.bf16.mxu1 %v3361_v1 }
 0x46b   :  { %1800 = vmatpush1.bf16.msra.mxu0 %v3911_v32 }
 0x46c   :  { %2102 = vmatprep.subr.bf16.mxu0 %v3795_v6 }
 0x46d   :  { %3041 = vmatpush3.bf16.msra.mxu1 %v3184_v0 }
 0x46e   :  { %3046 = vmatprep.subr.bf16.mxu1 %v3361_v1 }
 0x521   :  { %v1502_v55 = vpop.f32.mrb[16].mxu0  ;;  %v1545_v56 = vpop.f32.mrb[16].mxu1 }
 0x522   :  { %v1561_v57 = vadd.f32 %v1502_v55, %v1301_v53  ;;  %v1504_v58 = vpop.f32.mrb[17].mxu0  ;;  %v3024_v59 = vpop.f32.mrb[17].mxu1  ;;  %v1559_v63 = vadd.f32 %v4015_v36, %v1545_v56 }
 0x523   :  { %v1506_v60 = vpop.f32.mrb[18].mxu0  ;;  %v1548_v61 = vpop.f32.mrb[18].mxu1  ;;  %v1575_v13 = vadd.f32 %v1504_v58, %v1302_v4  ;;  %v2741_v58 = vld [vmem:[%s4220_s1 + $0x40] sm:$0xff]  ;;  %v2742_v59 = vld [vmem:[%s4220_s1 + $0x48] sm:$0xff] }
 0x524   :  { %v2735_v62 = vmul.f32 -1.442695, %v1561_v57  ;;  %v1562_v9 = vadd.f32 %v1506_v60, %v1304_v54  ;;  %v1508_v12 = vpop.f32.mrb[19].mxu0  ;;  %v3025_v3 = vpop.f32.mrb[19].mxu1  ;;  %v1560_v43 = vadd.f32 %v4015_v36, %v1548_v61  ;;  %v3190_v4 = vld [vmem:[%s4216_s3 + $0x80] ss:$12 sps:$4 sm:$0xff]  }
 0x525   :  { %v1576_v17 = vadd.f32 %v1508_v12, %v1305_v8  ;;  %v2737_v22 = vmul.f32 -1.442695, %v1575_v13  ;;  %v3187_v12 = vld [vmem:[%s4216_s3 + $0x38] ss:$12 sps:$4 sm:$0xff]   ;;  %v3189_v3 = vld [vmem:[%s4216_s3 + $0x68] ss:$12 sps:$4 sm:$0xff]  }
 0x526   :  { %3281 = vpow2.f32 %v2735_v62  ;;  %v2736_v5 = vmul.f32 -1.442695, %v1562_v9  ;;  %v3185_v62 = vld [vmem:[%s4216_s3 + $0x8] ss:$12 sps:$4 sm:$0xff]   ;;  %v3186_v9 = vld [vmem:[%s4216_s3 + $0x20] ss:$12 sps:$4 sm:$0xff]  }
 0x527   :  { %v2738_v27 = vmul.f32 -1.442695, %v1576_v17  ;;  %v3192_v8 = vld [vmem:[%s4216_s3 + $0xb0] ss:$12 sps:$4 sm:$0xff]   ;;  %v2745_v17 = vld [vmem:[%s4218_s0 + $0x84] sm:$0xff] }
 0x528   :  { %3283 = vpow2.f32 %v2736_v5  ;;  %v3191_v5 = vld [vmem:[%s4216_s3 + $0x98] ss:$12 sps:$4 sm:$0xff]  }
 0x529   :  { %3285 = vpow2.f32 %v2737_v22  ;;  %v2743_v13 = vld [vmem:[%s4218_s0 + $0x78] sm:$0xff] }
 0x52a   :  { %v1618_v22 = vunpack.c.l.bf16 %v2743_v13 }
 0x530   :  { %v3282_v20 = vpop.eup %3281 }
 0x531   :  { %v1569_v30 = vadd.f32 1.0, %v3282_v20  ;;  %v1621_v20 = vunpack.c.l.bf16 %v2745_v17 }
 0x532   :  { %v3284_v33 = vpop.eup %3283 }
 0x533   :  { %3287 = vrcp.f32 %v1569_v30  ;;  %v1570_v34 = vadd.f32 1.0, %v3284_v33  ;;  %v3286_v37 = vpop.eup %3285 }
 0x534   :  { %3289 = vpow2.f32 %v2738_v27  ;;  %v1583_v45 = vadd.f32 1.0, %v3286_v37 }
 0x535   :  { %3291 = vrcp.f32 %v1570_v34 }
 0x53d   :  { %v3288_v39 = vpop.eup %3287 }
 0x53e   :  { %v3290_v40 = vpop.eup %3289  ;;  %v1589_v41 = vmul.f32 %v3288_v39, %v1559_v63 }
 0x53f   :  { %v3292_v44 = vpop.eup %3291  ;;  %v1584_v49 = vadd.f32 1.0, %v3290_v40 }
 0x540   :  { %v1591_v46 = vadd.f32 %v1589_v41, %v1303_v38  ;;  %v1590_v47 = vmul.f32 %v3292_v44, %v1560_v43  ;;  %v1622_v44 = vunpack.c.h.bf16 %v2745_v17 }
 0x542   :  { %3293 = vtanh.f32 %v1591_v46  ;;  %v1592_v48 = vadd.f32 %v1590_v47, %v1306_v42  ;;  %v1619_v42 = vunpack.c.h.bf16 %v2743_v13 }
 0x543   :  { %3295 = vrcp.f32 %v1583_v45 }
 0x544   :  { %3297 = vtanh.f32 %v1592_v48 }
 0x545   :  { %3299 = vrcp.f32 %v1584_v49 }
 0x54c   :  { %v3294_v50 = vpop.eup %3293 }
 0x54d   :  { %v3296_v0 = vpop.eup %3295  ;;  %v1595_v51 = vsub.f32 %v3946_v23, %v3294_v50 }
 0x54e   :  { %v3298_v52 = vpop.eup %3297 }
 0x54f   :  { %v1596_v53 = vsub.f32 %v3948_v24, %v3298_v52  ;;  %v1597_v54 = vmul.f32 %v3296_v0, %v1595_v51  ;;  %v3300_v55 = vpop.eup %3299 }
 0x551   :  { %v1598_v56 = vmul.f32 %v3300_v55, %v1596_v53  ;;  %v1599_v57 = vadd.f32 %v3294_v50, %v1597_v54 }
 0x553   :  { %v1600_v60 = vadd.f32 %v3298_v52, %v1598_v56  ;;  %2739 = vst [vmem:[%s4221_s5 + $0x40] sm:$0xff] %v1599_v57  ;;  %v4033_v23 = vadd.f32 %v2741_v58, %v1599_v57  ;;  %v2744_v52 = vld [vmem:[%s4218_s0 + $0x80] ss:$12 sps:$4 sm:$0xff]  }
 0x554   :  { %v1620_v54 = vunpack.c.l.bf16 %v2744_v52 }
 0x555   :  { %2740 = vst [vmem:[%s4221_s5 + $0x48] sm:$0xff] %v1600_v60  ;;  %v4035_v24 = vadd.f32 %v2742_v59, %v1600_v60  ;;  %v1623_v59 = vunpack.c.h.bf16 %v2744_v52 }
 0x557   :  { %v1624_v61 = vpack.c.bf16 %v4035_v24, %v4033_v23 }
 0x559   :  { %1818 = vmatmul.mubr.bf16.vlgmr.msra.gmra.mrb[20].mxu0 %v1624_v61  ;;  %3043 = vmatmul.mubr.bf16.vlgmr.msra.gmra.mrb[20].mxu1 %v1624_v61 }
 0x55a   :  { %2103 = vmatpush1.bf16.msra.mxu0 %v3800_v7  ;;  %2134 = vmatprep.mubr.bf16.mxu0 %v3362_v2 }
 0x55b   :  { %2104 = vmatprep.subr.bf16.mxu0 %v3810_v10  ;;  %3062 = vmatprep.mubr.msk.bf16.mxu1 %vm3363_vm0, %v3361_v1 }
 0x55c   :  { %3047 = vmatpush3.bf16.msra.mxu1 %v3185_v62 }
 0x55d   :  { %3048 = vmatprep.subr.bf16.mxu1 %v3361_v1 }
 0x55e   :  { %2105 = vmatpush1.bf16.msra.mxu0 %v3816_v11 }
 0x55f   :  { %2106 = vmatprep.subr.bf16.mxu0 %v3826_v15 }
 0x560   :  { %3049 = vmatpush3.bf16.msra.mxu1 %v3186_v9 }
 0x561   :  { %3050 = vmatprep.subr.bf16.mxu1 %v3361_v1 }
 0x562   :  { %2107 = vmatpush1.bf16.msra.mxu0 %v3832_v16 }
 0x563   :  { %2108 = vmatprep.subr.bf16.mxu0 %v3842_v19 }
 0x564   :  { %3051 = vmatpush3.bf16.msra.mxu1 %v3187_v12 }
 0x565   :  { %3052 = vmatprep.subr.bf16.mxu1 %v3361_v1 }
 0x566   :  { %2109 = vmatpush1.bf16.msra.mxu0 %v3848_v21 }
 0x567   :  { %2110 = vmatprep.subr.bf16.mxu0 %v3857_v14 }
 0x56a   :  { %2111 = vmatpush1.bf16.msra.mxu0 %v3863_v18 }
 0x56b   :  { %2112 = vmatprep.subr.bf16.mxu0 %v3873_v25 }
 0x56e   :  { %2113 = vmatpush1.bf16.msra.mxu0 %v3879_v26 }
 0x56f   :  { %2114 = vmatprep.subr.bf16.mxu0 %v3889_v28 }
 0x572   :  { %2115 = vmatpush1.bf16.msra.mxu0 %v3895_v29 }
 0x573   :  { %2116 = vmatprep.subr.bf16.mxu0 %v3905_v31 }
 0x576   :  { %2117 = vmatpush1.bf16.msra.mxu0 %v3911_v32 }
 0x577   :  { %2419 = vmatprep.subr.bf16.mxu0 %v3795_v6  ;;  %v3188_v6 = vld [vmem:[%s4216_s3 + $0x50] ss:$12 sps:$4 sm:$0xff]  }
 0x578   :  { %3053 = vmatpush3.bf16.msra.mxu1 %v3188_v6 }
 0x579   :  { %3054 = vmatprep.subr.bf16.mxu1 %v3361_v1 }
 0x57c   :  { %3055 = vmatpush3.bf16.msra.mxu1 %v3189_v3 }
 0x57d   :  { %3056 = vmatprep.subr.bf16.mxu1 %v3361_v1 }
 0x580   :  { %3057 = vmatpush3.bf16.msra.mxu1 %v3190_v4 }
 0x581   :  { %3058 = vmatprep.subr.bf16.mxu1 %v3361_v1 }
 0x584   :  { %3059 = vmatpush3.bf16.msra.mxu1 %v3191_v5 }
 0x585   :  { %3060 = vmatprep.subr.bf16.mxu1 %v3361_v1 }
 0x588   :  { %3061 = vmatpush3.bf16.msra.mxu1 %v3192_v8 }
 0x589   :  { %3066 = vmatprep.subr.bf16.mxu1 %v3361_v1 }
 0x62c   :  { %v1819_v27 = vpop.f32.mrb[20].mxu0  ;;  %v1862_v30 = vpop.f32.mrb[20].mxu1 }
 0x62d   :  { %v1878_v33 = vadd.f32 %v1819_v27, %v1618_v22  ;;  %v1821_v34 = vpop.f32.mrb[21].mxu0  ;;  %v3044_v35 = vpop.f32.mrb[21].mxu1  ;;  %v1876_v55 = vadd.f32 %v4015_v36, %v1862_v30 }
 0x62e   :  { %v1823_v37 = vpop.f32.mrb[22].mxu0  ;;  %v1865_v38 = vpop.f32.mrb[22].mxu1  ;;  %v1892_v45 = vadd.f32 %v1821_v34, %v1619_v42  ;;  %v2779_v34 = vld [vmem:[%s4220_s1 + $0x58] sm:$0xff] }
 0x62f   :  { %v2772_v63 = vmul.f32 -1.442695, %v1878_v33  ;;  %v1879_v39 = vadd.f32 %v1823_v37, %v1621_v20  ;;  %v1825_v40 = vpop.f32.mrb[23].mxu0  ;;  %v3045_v41 = vpop.f32.mrb[23].mxu1  ;;  %v1877_v60 = vadd.f32 %v4015_v36, %v1865_v38  ;;  %v2778_v33 = vld [vmem:[%s4220_s1 + $0x50] sm:$0xff] }
 0x630   :  { %v1893_v46 = vadd.f32 %v1825_v40, %v1622_v44  ;;  %v2774_v47 = vmul.f32 -1.442695, %v1892_v45 }
 0x631   :  { %3301 = vpow2.f32 %v2772_v63  ;;  %v2773_v43 = vmul.f32 -1.442695, %v1879_v39 }
 0x632   :  { %v2775_v49 = vmul.f32 -1.442695, %v1893_v46 }
 0x633   :  { %3303 = vpow2.f32 %v2773_v43 }
 0x634   :  { %3305 = vpow2.f32 %v2774_v47 }
 0x63b   :  { %v3302_v48 = vpop.eup %3301 }
 0x63c   :  { %v1886_v50 = vadd.f32 1.0, %v3302_v48 }
 0x63d   :  { %v3304_v0 = vpop.eup %3303 }
 0x63e   :  { %3307 = vrcp.f32 %v1886_v50  ;;  %v1887_v51 = vadd.f32 1.0, %v3304_v0  ;;  %v3306_v53 = vpop.eup %3305 }
 0x63f   :  { %3309 = vpow2.f32 %v2775_v49  ;;  %v1900_v62 = vadd.f32 1.0, %v3306_v53  ;;  %v2781_v53 = vld [vmem:[%s4218_s0 + $0x98] ss:$12 sps:$4 sm:$0xff]  }
 0x640   :  { %3311 = vrcp.f32 %v1887_v51 }
 0x648   :  { %v3308_v56 = vpop.eup %3307 }
 0x649   :  { %v3310_v57 = vpop.eup %3309  ;;  %v1906_v58 = vmul.f32 %v3308_v56, %v1876_v55  ;;  %v1937_v55 = vunpack.c.l.bf16 %v2781_v53 }
 0x64a   :  { %v3312_v61 = vpop.eup %3311  ;;  %v1901_v3 = vadd.f32 1.0, %v3310_v57 }
 0x64b   :  { %v1908_v9 = vadd.f32 %v1906_v58, %v1620_v54  ;;  %v1907_v12 = vmul.f32 %v3312_v61, %v1877_v60  ;;  %v1940_v60 = vunpack.c.h.bf16 %v2781_v53 }
 0x64d   :  { %3313 = vtanh.f32 %v1908_v9  ;;  %v1909_v6 = vadd.f32 %v1907_v12, %v1623_v59 }
 0x64e   :  { %3315 = vrcp.f32 %v1900_v62 }
 0x64f   :  { %3317 = vtanh.f32 %v1909_v6 }
 0x650   :  { %3319 = vrcp.f32 %v1901_v3 }
 0x657   :  { %v3314_v4 = vpop.eup %3313 }
 0x658   :  { %v3316_v5 = vpop.eup %3315  ;;  %v1912_v8 = vsub.f32 %v4033_v23, %v3314_v4 }
 0x659   :  { %v3318_v13 = vpop.eup %3317 }
 0x65a   :  { %v1913_v17 = vsub.f32 %v4035_v24, %v3318_v13  ;;  %v1914_v22 = vmul.f32 %v3316_v5, %v1912_v8  ;;  %v3320_v20 = vpop.eup %3319 }
 0x65c   :  { %v1915_v27 = vmul.f32 %v3320_v20, %v1913_v17  ;;  %v1916_v30 = vadd.f32 %v3314_v4, %v1914_v22 }
 0x65e   :  { %v1917_v35 = vadd.f32 %v3318_v13, %v1915_v27  ;;  %2776 = vst [vmem:[%s4221_s5 + $0x50] sm:$0xff] %v1916_v30  ;;  %v4115_v23 = vadd.f32 %v2778_v33, %v1916_v30 }
 0x660   :  { %2777 = vst [vmem:[%s4221_s5 + $0x58] sm:$0xff] %v1917_v35  ;;  %v4117_v24 = vadd.f32 %v2779_v34, %v1917_v35  ;;  %v2815_v34 = vld [vmem:[%s4220_s1 + $0x60] sm:$0xff]  ;;  %v2816_v35 = vld [vmem:[%s4220_s1 + $0x68] sm:$0xff] }
 0x662   :  { %v1941_v37 = vpack.c.bf16 %v4117_v24, %v4115_v23 }
 0x664   :  { %2135 = vmatmul.mubr.bf16.vlgmr.msra.gmra.mrb[24].mxu0 %v1941_v37  ;;  %3063 = vmatmul.mubr.bf16.vlgmr.msra.gmra.mrb[24].mxu1 %v1941_v37 }
 0x665   :  { %2420 = vmatpush1.bf16.msra.mxu0 %v3800_v7  ;;  %2451 = vmatprep.mubr.bf16.mxu0 %v3362_v2  ;;  %v3193_v2 = vld [vmem:[%s4216_s3 + $0x8] ss:$12 sps:$4 sm:$0xff]   ;;  %v3194_v7 = vld [vmem:[%s4216_s3 + $0x20] ss:$12 sps:$4 sm:$0xff]  }
 0x666   :  { %2421 = vmatprep.subr.bf16.mxu0 %v3810_v10  ;;  %3082 = vmatprep.mubr.msk.bf16.mxu1 %vm3363_vm0, %v3361_v1  ;;  %v3195_v10 = vld [vmem:[%s4216_s3 + $0x38] ss:$12 sps:$4 sm:$0xff]  }
 0x667   :  { %3067 = vmatpush3.bf16.msra.mxu1 %v3193_v2 }
 0x668   :  { %3068 = vmatprep.subr.bf16.mxu1 %v3361_v1 }
 0x669   :  { %2422 = vmatpush1.bf16.msra.mxu0 %v3816_v11  ;;  %v3196_v11 = vld [vmem:[%s4216_s3 + $0x50] ss:$12 sps:$4 sm:$0xff]  }
 0x66a   :  { %2423 = vmatprep.subr.bf16.mxu0 %v3826_v15  ;;  %v3197_v15 = vld [vmem:[%s4216_s3 + $0x68] ss:$12 sps:$4 sm:$0xff]  }
 0x66b   :  { %3069 = vmatpush3.bf16.msra.mxu1 %v3194_v7  ;;  %v2817_v7 = vld [vmem:[%s4218_s0 + $0xa8] sm:$0xff] }
 0x66c   :  { %3070 = vmatprep.subr.bf16.mxu1 %v3361_v1 }
 0x66d   :  { %2424 = vmatpush1.bf16.msra.mxu0 %v3832_v16  ;;  %v3198_v16 = vld [vmem:[%s4216_s3 + $0x80] ss:$12 sps:$4 sm:$0xff]  }
 0x66e   :  { %2425 = vmatprep.subr.bf16.mxu0 %v3842_v19  ;;  %v3199_v19 = vld [vmem:[%s4216_s3 + $0x98] ss:$12 sps:$4 sm:$0xff]  }
 0x66f   :  { %3071 = vmatpush3.bf16.msra.mxu1 %v3195_v10  ;;  %v2819_v10 = vld [vmem:[%s4218_s0 + $0xb4] sm:$0xff] }
 0x670   :  { %3072 = vmatprep.subr.bf16.mxu1 %v3361_v1 }
 0x671   :  { %2426 = vmatpush1.bf16.msra.mxu0 %v3848_v21  ;;  %v3200_v21 = vld [vmem:[%s4216_s3 + $0xb0] ss:$12 sps:$4 sm:$0xff]  }
 0x672   :  { %2427 = vmatprep.subr.bf16.mxu0 %v3857_v14  ;;  %v2780_v14 = vld [vmem:[%s4218_s0 + $0x90] sm:$0xff] }
 0x673   :  { %3073 = vmatpush3.bf16.msra.mxu1 %v3196_v11  ;;  %v1936_v43 = vunpack.c.h.bf16 %v2780_v14  ;;  %v2252_v11 = vunpack.c.l.bf16 %v2817_v7 }
 0x674   :  { %3074 = vmatprep.subr.bf16.mxu1 %v3361_v1 }
 0x675   :  { %2428 = vmatpush1.bf16.msra.mxu0 %v3863_v18  ;;  %v2782_v18 = vld [vmem:[%s4218_s0 + $0x9c] sm:$0xff] }
 0x676   :  { %2429 = vmatprep.subr.bf16.mxu0 %v3873_v25  ;;  %v1935_v25 = vunpack.c.l.bf16 %v2780_v14  ;;  %v1939_v45 = vunpack.c.h.bf16 %v2782_v18 }
 0x677   :  { %3075 = vmatpush3.bf16.msra.mxu1 %v3197_v15  ;;  %v2255_v15 = vunpack.c.l.bf16 %v2819_v10 }
 0x678   :  { %3076 = vmatprep.subr.bf16.mxu1 %v3361_v1 }
 0x679   :  { %2430 = vmatpush1.bf16.msra.mxu0 %v3879_v26  ;;  %v1938_v26 = vunpack.c.l.bf16 %v2782_v18 }
 0x67a   :  { %2431 = vmatprep.subr.bf16.mxu0 %v3889_v28 }
 0x67b   :  { %3077 = vmatpush3.bf16.msra.mxu1 %v3198_v16 }
 0x67c   :  { %3078 = vmatprep.subr.bf16.mxu1 %v3361_v1 }
 0x67d   :  { %2432 = vmatpush1.bf16.msra.mxu0 %v3895_v29 }
 0x67e   :  { %2433 = vmatprep.subr.bf16.mxu0 %v3905_v31 }
 0x67f   :  { %3079 = vmatpush3.bf16.msra.mxu1 %v3199_v19 }
 0x680   :  { %3080 = vmatprep.subr.bf16.mxu1 %v3361_v1 }
 0x681   :  { %2434 = vmatpush1.bf16.msra.mxu0 %v3911_v32 }
 0x683   :  { %3081 = vmatpush3.bf16.msra.mxu1 %v3200_v21 }
 0x737   :  { %v2136_v28 = vpop.f32.mrb[24].mxu0  ;;  %v2179_v29 = vpop.f32.mrb[24].mxu1 }
 0x738   :  { %v2195_v31 = vadd.f32 %v2136_v28, %v1935_v25  ;;  %v2138_v32 = vpop.f32.mrb[25].mxu0  ;;  %v3064_v38 = vpop.f32.mrb[25].mxu1  ;;  %v2193_v56 = vadd.f32 %v4015_v36, %v2179_v29 }
 0x739   :  { %v2140_v63 = vpop.f32.mrb[26].mxu0  ;;  %v2182_v39 = vpop.f32.mrb[26].mxu1  ;;  %v2209_v46 = vadd.f32 %v2138_v32, %v1936_v43  ;;  %v2253_v38 = vunpack.c.h.bf16 %v2817_v7 }
 0x73a   :  { %v2809_v40 = vmul.f32 -1.442695, %v2195_v31  ;;  %v2196_v1 = vadd.f32 %v2140_v63, %v1938_v26  ;;  %v2142_v41 = vpop.f32.mrb[27].mxu0  ;;  %v3065_v42 = vpop.f32.mrb[27].mxu1  ;;  %v2194_v61 = vadd.f32 %v4015_v36, %v2182_v39  ;;  %v2256_v39 = vunpack.c.h.bf16 %v2819_v10 }
 0x73b   :  { %v2210_v47 = vadd.f32 %v2142_v41, %v1939_v45  ;;  %v2811_v48 = vmul.f32 -1.442695, %v2209_v46 }
 0x73c   :  { %3321 = vpow2.f32 %v2809_v40  ;;  %v2810_v44 = vmul.f32 -1.442695, %v2196_v1 }
 0x73d   :  { %v2812_v50 = vmul.f32 -1.442695, %v2210_v47  ;;  %v2818_v47 = vld [vmem:[%s4218_s0 + $0xb0] ss:$12 sps:$4 sm:$0xff]  }
 0x73e   :  { %3323 = vpow2.f32 %v2810_v44  ;;  %v2257_v53 = vunpack.c.h.bf16 %v2818_v47 }
 0x73f   :  { %3325 = vpow2.f32 %v2811_v48 }
 0x746   :  { %v3322_v49 = vpop.eup %3321 }
 0x747   :  { %v2203_v0 = vadd.f32 1.0, %v3322_v49  ;;  %v2254_v49 = vunpack.c.l.bf16 %v2818_v47 }
 0x748   :  { %v3324_v51 = vpop.eup %3323 }
 0x749   :  { %3327 = vrcp.f32 %v2203_v0  ;;  %v2204_v52 = vadd.f32 1.0, %v3324_v51  ;;  %v3326_v54 = vpop.eup %3325 }
 0x74a   :  { %3329 = vpow2.f32 %v2812_v50  ;;  %v2217_v9 = vadd.f32 1.0, %v3326_v54 }
 0x74b   :  { %3331 = vrcp.f32 %v2204_v52 }
 0x753   :  { %v3328_v57 = vpop.eup %3327 }
 0x754   :  { %v3330_v58 = vpop.eup %3329  ;;  %v2223_v59 = vmul.f32 %v3328_v57, %v2193_v56 }
 0x755   :  { %v3332_v62 = vpop.eup %3331  ;;  %v2218_v4 = vadd.f32 1.0, %v3330_v58 }
 0x756   :  { %v2225_v12 = vadd.f32 %v2223_v59, %v1937_v55  ;;  %v2224_v6 = vmul.f32 %v3332_v62, %v2194_v61 }
 0x758   :  { %3333 = vtanh.f32 %v2225_v12  ;;  %v2226_v3 = vadd.f32 %v2224_v6, %v1940_v60 }
 0x759   :  { %3335 = vrcp.f32 %v2217_v9 }
 0x75a   :  { %3337 = vtanh.f32 %v2226_v3 }
 0x75b   :  { %3339 = vrcp.f32 %v2218_v4 }
 0x762   :  { %v3334_v5 = vpop.eup %3333 }
 0x763   :  { %v3336_v8 = vpop.eup %3335  ;;  %v2229_v13 = vsub.f32 %v4115_v23, %v3334_v5 }
 0x764   :  { %v3338_v17 = vpop.eup %3337 }
 0x765   :  { %v2230_v22 = vsub.f32 %v4117_v24, %v3338_v17  ;;  %v2231_v20 = vmul.f32 %v3336_v8, %v2229_v13  ;;  %v3340_v27 = vpop.eup %3339 }
 0x767   :  { %v2232_v30 = vmul.f32 %v3340_v27, %v2230_v22  ;;  %v2233_v33 = vadd.f32 %v3334_v5, %v2231_v20 }
 0x769   :  { %v2234_v37 = vadd.f32 %v3338_v17, %v2232_v30  ;;  %2813 = vst [vmem:[%s4221_s5 + $0x60] sm:$0xff] %v2233_v33  ;;  %v2241_v23 = vadd.f32 %v2815_v34, %v2233_v33 }
 0x76b   :  { %2814 = vst [vmem:[%s4221_s5 + $0x68] sm:$0xff] %v2234_v37  ;;  %v4195_v24 = vadd.f32 %v2816_v35, %v2234_v37 }
 0x76d   :  { %v2258_v2 = vpack.c.bf16 %v4195_v24, %v2241_v23 }
 0x76f   :  { %2452 = vmatmul.mubr.bf16.vlgmr.msra.gmra.mrb[28].mxu0 %v2258_v2  ;;  %3083 = vmatmul.mubr.bf16.vlgmr.msra.gmra.mrb[28].mxu1 %v2258_v2 }
 0x842   :  { %v2453_v16 = vpop.f32.mrb[28].mxu0  ;;  %v2496_v19 = vpop.f32.mrb[28].mxu1 }
 0x843   :  { %v2512_v21 = vadd.f32 %v2453_v16, %v2252_v11  ;;  %v2455_v14 = vpop.f32.mrb[29].mxu0  ;;  %v3084_v18 = vpop.f32.mrb[29].mxu1  ;;  %v2510_v50 = vadd.f32 %v4015_v36, %v2496_v19 }
 0x844   :  { %v2457_v25 = vpop.f32.mrb[30].mxu0  ;;  %v2499_v26 = vpop.f32.mrb[30].mxu1  ;;  %v2526_v40 = vadd.f32 %v2455_v14, %v2253_v38 }
 0x845   :  { %v2846_v28 = vmul.f32 -1.442695, %v2512_v21  ;;  %v2513_v29 = vadd.f32 %v2457_v25, %v2255_v15  ;;  %v2459_v31 = vpop.f32.mrb[31].mxu0  ;;  %v3085_v32 = vpop.f32.mrb[31].mxu1  ;;  %v2511_v54 = vadd.f32 %v4015_v36, %v2499_v26 }
 0x846   :  { %v2527_v1 = vadd.f32 %v2459_v31, %v2256_v39  ;;  %v2848_v41 = vmul.f32 -1.442695, %v2526_v40 }
 0x847   :  { %3341 = vpow2.f32 %v2846_v28  ;;  %v2847_v63 = vmul.f32 -1.442695, %v2513_v29 }
 0x848   :  { %v2849_v43 = vmul.f32 -1.442695, %v2527_v1 }
 0x849   :  { %3343 = vpow2.f32 %v2847_v63 }
 0x84a   :  { %3345 = vpow2.f32 %v2848_v41 }
 0x851   :  { %v3342_v42 = vpop.eup %3341 }
 0x852   :  { %v2520_v44 = vadd.f32 1.0, %v3342_v42 }
 0x853   :  { %v3344_v45 = vpop.eup %3343 }
 0x854   :  { %3347 = vrcp.f32 %v2520_v44  ;;  %v2521_v46 = vadd.f32 1.0, %v3344_v45  ;;  %v3346_v48 = vpop.eup %3345 }
 0x855   :  { %3349 = vpow2.f32 %v2849_v43  ;;  %v2534_v56 = vadd.f32 1.0, %v3346_v48 }
 0x856   :  { %3351 = vrcp.f32 %v2521_v46 }
 0x85e   :  { %v3348_v0 = vpop.eup %3347 }
 0x85f   :  { %v3350_v51 = vpop.eup %3349  ;;  %v2540_v52 = vmul.f32 %v3348_v0, %v2510_v50 }
 0x860   :  { %v3352_v55 = vpop.eup %3351  ;;  %v2535_v60 = vadd.f32 1.0, %v3350_v51 }
 0x861   :  { %v2542_v57 = vadd.f32 %v2540_v52, %v2254_v49  ;;  %v2541_v58 = vmul.f32 %v3352_v55, %v2511_v54 }
 0x863   :  { %3353 = vtanh.f32 %v2542_v57  ;;  %v2543_v59 = vadd.f32 %v2541_v58, %v2257_v53 }
 0x864   :  { %3355 = vrcp.f32 %v2534_v56 }
 0x865   :  { %3357 = vtanh.f32 %v2543_v59 }
 0x866   :  { %3359 = vrcp.f32 %v2535_v60 }
 0x86d   :  { %v3354_v61 = vpop.eup %3353 }
 0x86e   :  { %v3356_v62 = vpop.eup %3355  ;;  %v2546_v9 = vsub.f32 %v2241_v23, %v3354_v61 }
 0x86f   :  { %v3358_v12 = vpop.eup %3357 }
 0x870   :  { %v2548_v6 = vmul.f32 %v3356_v62, %v2546_v9  ;;  %v2547_v3 = vsub.f32 %v4195_v24, %v3358_v12  ;;  %v3360_v4 = vpop.eup %3359 }
 0x872   :  { %v2550_v5 = vadd.f32 %v3354_v61, %v2548_v6  ;;  %v2549_v36 = vmul.f32 %v3360_v4, %v2547_v3 }
 0x874   :  { %2850 = vst [vmem:[%s4221_s5 + $0x70] sm:$0xff] %v2550_v5  ;;  %v2551_v8 = vadd.f32 %v3358_v12, %v2549_v36 }
 0x876   :  { %2851 = vst [vmem:[%s4221_s5 + $0x78] sm:$0xff] %v2551_v8 }

</bundles_post_ra>
